<compile_context>
chip_gen: v7x
topology: tpu7x:2x2x1
jax: 0.10.0
libtpu: 0.0.40
codegen_flags: <defaults>
</compile_context>

<pallas_src>
import functools

import jax
import jax.numpy as jnp
from jax import lax
from jax.experimental import pallas as pl
from jax.experimental.pallas import tpu as pltpu


_TAPS = tuple((dy, dx) for dy in range(3) for dx in range(3))


# --------------------------------------------------------------------------
# Fused head kernel: all conv layers of both branches for one batch block.
# Activations are (C, flat) with flat = nb * (H+2)*(W+2) on lanes.
# --------------------------------------------------------------------------
def _head_kernel(*refs, num_convs, conv_channels, H, W, nb):
    Wp = W + 2
    Lp = (H + 2) * Wp
    Lblk = nb * Lp
    p0 = Wp + 1                 # first interior flat position
    M = Lblk - 2 * p0           # contiguous computed range [p0, p0 + M)

    x_ref, mask_ref = refs[0], refs[1]
    pos = 2
    w0_ref, b0_ref = refs[pos], refs[pos + 1]          # fused layer-0 (cls|box)
    pos += 2
    trunk = []
    for _ in range(num_convs - 1):
        trunk.append(refs[pos:pos + 4])                 # (cls_w, cls_b, box_w, box_b)
        pos += 4
    score_w, score_b, pred_w, pred_b = refs[pos:pos + 4]
    pos += 4
    logits_ref, bbox_ref = refs[pos], refs[pos + 1]
    pos += 2
    cls_pad, box_pad = refs[pos], refs[pos + 1]

    cc = conv_channels
    mask = mask_ref[...]                                # (1, M) interior mask

    def conv(tap_fn, w_ref, b_ref, relu):
        # 9 accumulated matmuls over lane-shifted tap slices (no im2col).
        acc = None
        for k, (dy, dx) in enumerate(_TAPS):
            start = p0 + (dy - 1) * Wp + (dx - 1)       # static, in [0, 2*Wp+2]
            part = jnp.dot(w_ref[k], tap_fn(start),
                           preferred_element_type=jnp.float32)
            acc = part if acc is None else acc + part
        y = acc + b_ref[...]                            # (Cout,1) broadcast
        return jnp.maximum(y, 0.0) if relu else y       # (Cout, M)

    x_tap = lambda s: x_ref[0, :, s:s + M]              # (Cin, M) from padded input
    cls_tap = lambda s: cls_pad[:, s:s + M]
    box_tap = lambda s: box_pad[:, s:s + M]

    # Halo-only zeroing: the (Wp+1)-wide head/tail are read but never written
    # by the masked interior write-backs.  Zeroed every step (parallel-safe).
    halo = jnp.zeros((cc, p0), jnp.float32)
    cls_pad[:, 0:p0] = halo
    cls_pad[:, p0 + M:] = halo
    box_pad[:, 0:p0] = halo
    box_pad[:, p0 + M:] = halo

    # ---- fused layer 0: one matmul for both branches (shared input) -------
    y0 = conv(x_tap, w0_ref, b0_ref, relu=True) * mask  # (2*cc, M)
    cls_pad[:, p0:p0 + M] = y0[0:cc]
    box_pad[:, p0:p0 + M] = y0[cc:2 * cc]

    # ---- remaining trunk layers (branches have different inputs) ----------
    for cw, cb, bw, bb in trunk:
        cls_pad[:, p0:p0 + M] = conv(cls_tap, cw, cb, relu=True) * mask
        box_pad[:, p0:p0 + M] = conv(box_tap, bw, bb, relu=True) * mask

    # ---- heads (no ReLU); outputs are already lane-dense -------------------
    logits_ref[0] = conv(cls_tap, score_w, score_b, relu=False)
    bbox_ref[0] = conv(box_tap, pred_w, pred_b, relu=False)


# --------------------------------------------------------------------------
# Wrapper: one fused pallas_call per feature level.
# --------------------------------------------------------------------------
def _pick_nb(N, H, W):
    # Fold nb batch elements into one block so the output lane dim >= 128.
    Lp = (H + 2) * (W + 2)
    p0 = W + 3
    for nb in range(1, N + 1):
        if N % nb == 0 and nb * Lp - 2 * p0 >= 128:
            return nb
    return N


def _w9(w_hwio):
    # (3,3,Cin,Cout) -> (9, Cout, Cin), tap order matches _TAPS (dy*3+dx).
    kh, kw, cin, cout = w_hwio.shape
    return jnp.transpose(w_hwio, (0, 1, 3, 2)).reshape(kh * kw, cout, cin)


def retinanet_head_level(x_nchw, params, *, num_convs, num_classes,
                         conv_channels, in_channels):
    N, C, H, W = x_nchw.shape
    assert C == in_channels
    assert num_convs >= 1
    Hp, Wp = H + 2, W + 2
    Lp = Hp * Wp
    nb = _pick_nb(N, H, W)
    G = N // nb
    Lblk = nb * Lp
    p0 = Wp + 1
    M = Lblk - 2 * p0
    cc = conv_channels

    # Fold: zero-pad spatially, flatten, concat nb batch elements along lanes.
    x_pad = jnp.pad(x_nchw, ((0, 0), (0, 0), (1, 1), (1, 1)))
    x_fold = (x_pad.reshape(N, C, Lp).reshape(G, nb, C, Lp)
              .transpose(0, 2, 1, 3).reshape(G, C, Lblk))

    # Interior mask over the computed flat range [p0, p0 + M).
    idx = jnp.arange(M, dtype=jnp.int32) + p0
    q = idx % Lp
    r = q // Wp
    c = q % Wp
    mask = (((r >= 1) & (r <= H) & (c >= 1) & (c <= W))
            .astype(jnp.float32).reshape(1, M))

    inputs = [x_fold, mask]
    in_specs = [pl.BlockSpec((1, C, Lblk), lambda g: (g, 0, 0)),
                pl.BlockSpec((1, M), lambda g: (0, 0))]

    def add_const(arr):
        # Full-array block + constant index map: DMA'd once, stays VMEM resident.
        inputs.append(arr)
        in_specs.append(
            pl.BlockSpec(arr.shape, lambda g, _nd=arr.ndim: (0,) * _nd))

    # Layer-0 weights of both branches fused along Cout.
    add_const(jnp.concatenate([_w9(params["cls_w"][0]),
                               _w9(params["box_w"][0])], axis=1))
    add_const(jnp.concatenate([params["cls_b"][0],
                               params["box_b"][0]]).reshape(2 * cc, 1))
    for i in range(1, num_convs):
        add_const(_w9(params["cls_w"][i]))
        add_const(params["cls_b"][i].reshape(cc, 1))
        add_const(_w9(params["box_w"][i]))
        add_const(params["box_b"][i].reshape(cc, 1))
    add_const(_w9(params["score_w"]))
    add_const(params["score_b"].reshape(-1, 1))
    add_const(_w9(params["pred_w"]))
    add_const(params["pred_b"].reshape(-1, 1))

    kernel = functools.partial(
        _head_kernel, num_convs=num_convs, conv_channels=cc, H=H, W=W, nb=nb)

    out_shape = (jax.ShapeDtypeStruct((G, num_classes, M), jnp.float32),
                 jax.ShapeDtypeStruct((G, 4, M), jnp.float32))
    out_specs = [pl.BlockSpec((1, num_classes, M), lambda g: (g, 0, 0)),
                 pl.BlockSpec((1, 4, M), lambda g: (g, 0, 0))]
    scratch_shapes = [pltpu.VMEM((cc, Lblk), jnp.float32),   # cls trunk activations
                      pltpu.VMEM((cc, Lblk), jnp.float32)]   # box trunk activations

    logits_flat, bbox_flat = pl.pallas_call(
        kernel,
        out_shape=out_shape,
        grid_spec=pltpu.PrefetchScalarGridSpec(
            num_scalar_prefetch=0,
            grid=(G,),
            in_specs=in_specs,
            out_specs=out_specs,
            scratch_shapes=scratch_shapes),
        compiler_params=pltpu.CompilerParams(
            dimension_semantics=("parallel",),
            vmem_limit_bytes=32 * 1024 * 1024),
    )(*inputs)

    def unfold(o):
        # (G, Cout, M) flat-padded layout -> (N, Cout, H, W); pure layout plumbing.
        cout = o.shape[1]
        o = jnp.pad(o, ((0, 0), (0, 0), (p0, p0)))                # -> (G, Cout, Lblk)
        o = o.reshape(G, cout, nb, Hp, Wp)[:, :, :, 1:H + 1, 1:W + 1]
        return jnp.transpose(o, (0, 2, 1, 3, 4)).reshape(N, cout, H, W)

    return unfold(logits_flat), unfold(bbox_flat)


def forward_eval(features_nchw, params, *, num_convs, num_classes,
                 conv_channels, in_channels):
    logits, bbox_pred = [], []
    for x in features_nchw:
        lg, bp = retinanet_head_level(
            x, params, num_convs=num_convs, num_classes=num_classes,
            conv_channels=conv_channels, in_channels=in_channels)
        logits.append(lg)
        bbox_pred.append(bp)
    return logits, bbox_pred


# --------------------------------------------------------------------------
# Parameter construction (deterministic) + BN merge (== _bn_convert, eps=1e-10)
# --------------------------------------------------------------------------
def _oihw_to_hwio(w):
    return jnp.transpose(w, (2, 3, 1, 0))  # (Cout,Cin,3,3) -> (3,3,Cin,Cout)


def init_params(key, num_classes, in_channels, conv_channels, num_convs):
    num_anchors = 1  # forced to 1 in the reference __init__
    keys = iter(jax.random.split(key, 10 * num_convs + 8))  # generous headroom
    params = {"cls_w": [], "cls_b": [], "box_w": [], "box_b": []}
    channels = in_channels
    for _ in range(num_convs):
        for branch in ("cls", "box"):
            w = 0.01 * jax.random.normal(next(keys),
                                         (conv_channels, channels, 3, 3),
                                         jnp.float32)
            gamma = 1.0 + 0.1 * jax.random.normal(next(keys), (conv_channels,))
            beta = 0.1 * jax.random.normal(next(keys), (conv_channels,))
            running_mean = 0.1 * jax.random.normal(next(keys), (conv_channels,))
            running_var = 1.0 + 0.1 * jax.random.uniform(next(keys),
                                                         (conv_channels,))
            # _bn_convert: fold BN into conv weight + bias (eps=1e-10 as in the module)
            scale = gamma * lax.rsqrt(running_var + 1e-10)
            bias = beta - scale * running_mean
            w_merged = w * scale[:, None, None, None]
            params[f"{branch}_w"].append(_oihw_to_hwio(w_merged))
            params[f"{branch}_b"].append(bias)
        channels = conv_channels

    # cls_score: weight ~ N(0, 0.01), bias = 0
    w_score = 0.01 * jax.random.normal(
        next(keys), (num_anchors * num_classes, channels, 3, 3), jnp.float32)
    params["score_w"] = _oihw_to_hwio(w_score)
    params["score_b"] = jnp.zeros((num_anchors * num_classes,), jnp.float32)

    # bbox_pred: weight ~ N(0, 0.01), small deterministic bias
    w_pred = 0.01 * jax.random.normal(
        next(keys), (num_anchors * 4, channels, 3, 3), jnp.float32)
    params["pred_w"] = _oihw_to_hwio(w_pred)
    params["pred_b"] = 0.01 * jax.random.uniform(
        next(keys), (num_anchors * 4,), jnp.float32, minval=-1.0, maxval=1.0)
    return params


# --------------------------------------------------------------------------
# Pure-JAX reference (for correctness check)
# --------------------------------------------------------------------------
def _conv3x3_ref(x_nhwc, w_hwio, b, apply_relu):
    y = lax.conv_general_dilated(
        x_nhwc, w_hwio, window_strides=(1, 1), padding="SAME",
        dimension_numbers=("NHWC", "HWIO", "NHWC"),
        precision=lax.Precision.HIGHEST)
    y = y + b.reshape(1, 1, 1, -1)
    return jnp.maximum(y, 0.0) if apply_relu else y


def forward_ref(features_nchw, params, num_convs):
    logits, bbox_pred = [], []
    for x in features_nchw:
        x_nhwc = jnp.transpose(x, (0, 2, 3, 1))
        cls_f, box_f = x_nhwc, x_nhwc
        for i in range(num_convs):
            cls_f = _conv3x3_ref(cls_f, params["cls_w"][i],
                                 params["cls_b"][i], True)
            box_f = _conv3x3_ref(box_f, params["box_w"][i],
                                 params["box_b"][i], True)
        lg = _conv3x3_ref(cls_f, params["score_w"], params["score_b"], False)
        bp = _conv3x3_ref(box_f, params["pred_w"], params["pred_b"], False)
        logits.append(jnp.transpose(lg, (0, 3, 1, 2)))
        bbox_pred.append(jnp.transpose(bp, (0, 3, 1, 2)))
    return logits, bbox_pred


if __name__ == "__main__":
    num_classes = 4
    in_channels = 4
    conv_channels = 8
    num_convs = 2
    batch = 2

    key = jax.random.PRNGKey(0)
    kp, kf1, kf2 = jax.random.split(key, 3)
    params = init_params(kp, num_classes, in_channels, conv_channels,
                         num_convs)

    # Two FPN-style feature levels, NCHW (matching the PyTorch conv inputs).
    features = [
        jax.random.normal(kf1, (batch, in_channels, 16, 16), jnp.float32),
        jax.random.normal(kf2, (batch, in_channels, 8, 8), jnp.float32),
    ]

    logits, bbox = forward_eval(features, params, num_convs=num_convs,
                                num_classes=num_classes,
                                conv_channels=conv_channels,
                                in_channels=in_channels)
    jax.block_until_ready(logits)
    jax.block_until_ready(bbox)

    # Verify against the pure-JAX reference conv.
    logits_ref, bbox_ref = forward_ref(features, params, num_convs)
    for a, b in zip(logits, logits_ref):
        assert a.shape == b.shape
        assert jnp.allclose(a, b, atol=1e-4, rtol=1e-4)
    for a, b in zip(bbox, bbox_ref):
        assert a.shape == b.shape
        assert jnp.allclose(a, b, atol=1e-4, rtol=1e-4)

    print("KERNEL_OK")
</pallas_src>

<mosaic_0001>
module attributes {stable_mosaic.version = 11 : i64} {
  func.func @_head_kernel(%arg0: i32, %arg1: memref<1x4x324xf32, #tpu.memory_space<vmem>>, %arg2: memref<1x286xf32, #tpu.memory_space<vmem>>, %arg3: memref<9x16x4xf32, #tpu.memory_space<vmem>>, %arg4: memref<16x1xf32, #tpu.memory_space<vmem>>, %arg5: memref<9x8x8xf32, #tpu.memory_space<vmem>>, %arg6: memref<8x1xf32, #tpu.memory_space<vmem>>, %arg7: memref<9x8x8xf32, #tpu.memory_space<vmem>>, %arg8: memref<8x1xf32, #tpu.memory_space<vmem>>, %arg9: memref<9x4x8xf32, #tpu.memory_space<vmem>>, %arg10: memref<4x1xf32, #tpu.memory_space<vmem>>, %arg11: memref<9x4x8xf32, #tpu.memory_space<vmem>>, %arg12: memref<4x1xf32, #tpu.memory_space<vmem>>, %arg13: memref<1x4x286xf32, #tpu.memory_space<vmem>>, %arg14: memref<1x4x286xf32, #tpu.memory_space<vmem>>, %arg15: memref<8x324xf32, #tpu.memory_space<vmem>>, %arg16: memref<8x324xf32, #tpu.memory_space<vmem>>) attributes {dimension_semantics = [#tpu.dimension_semantics<parallel>], iteration_bounds = array<i64: 2>, scalar_prefetch = 0 : i64, scratch_operands = 2 : i64, tpu.core_type = #tpu.core_type<tc>, window_params = [{transform_indices = @transform_0, window_bounds = array<i64: 1, 4, 324>}, {pipeline_mode = #tpu.pipeline_mode<synchronous>, transform_indices = @transform_1, window_bounds = array<i64: 1, 286>}, {pipeline_mode = #tpu.pipeline_mode<synchronous>, transform_indices = @transform_2, window_bounds = array<i64: 9, 16, 4>}, {pipeline_mode = #tpu.pipeline_mode<synchronous>, transform_indices = @transform_3, window_bounds = array<i64: 16, 1>}, {pipeline_mode = #tpu.pipeline_mode<synchronous>, transform_indices = @transform_4, window_bounds = array<i64: 9, 8, 8>}, {pipeline_mode = #tpu.pipeline_mode<synchronous>, transform_indices = @transform_5, window_bounds = array<i64: 8, 1>}, {pipeline_mode = #tpu.pipeline_mode<synchronous>, transform_indices = @transform_6, window_bounds = array<i64: 9, 8, 8>}, {pipeline_mode = #tpu.pipeline_mode<synchronous>, transform_indices = @transform_7, window_bounds = array<i64: 8, 1>}, {pipeline_mode = #tpu.pipeline_mode<synchronous>, transform_indices = @transform_8, window_bounds = array<i64: 9, 4, 8>}, {pipeline_mode = #tpu.pipeline_mode<synchronous>, transform_indices = @transform_9, window_bounds = array<i64: 4, 1>}, {pipeline_mode = #tpu.pipeline_mode<synchronous>, transform_indices = @transform_10, window_bounds = array<i64: 9, 4, 8>}, {pipeline_mode = #tpu.pipeline_mode<synchronous>, transform_indices = @transform_11, window_bounds = array<i64: 4, 1>}, {transform_indices = @transform_12, window_bounds = array<i64: 1, 4, 286>}, {transform_indices = @transform_13, window_bounds = array<i64: 1, 4, 286>}]} {
    %c0 = arith.constant 0 : index
    %c0_0 = arith.constant 0 : index
    %0 = vector.load %arg2[%c0, %c0_0] : memref<1x286xf32, #tpu.memory_space<vmem>>, vector<1x286xf32>
    %cst = arith.constant 0.000000e+00 : f32
    %1 = vector.broadcast %cst : f32 to vector<8x19xf32>
    %c0_1 = arith.constant 0 : index
    %c0_2 = arith.constant 0 : index
    %2 = vector.load %arg15[%c0_1, %c0_2] : memref<8x324xf32, #tpu.memory_space<vmem>>, vector<8x19xf32>
    tpu.vector_store %arg15[%c0_1, %c0_2], %1 {strides = array<i32>} : memref<8x324xf32, #tpu.memory_space<vmem>>, vector<8x19xf32>,
    %c0_3 = arith.constant 0 : index
    %c305 = arith.constant 305 : index
    %3 = vector.load %arg15[%c0_3, %c305] : memref<8x324xf32, #tpu.memory_space<vmem>>, vector<8x19xf32>
    tpu.vector_store %arg15[%c0_3, %c305], %1 {strides = array<i32>} : memref<8x324xf32, #tpu.memory_space<vmem>>, vector<8x19xf32>,
    %c0_4 = arith.constant 0 : index
    %c0_5 = arith.constant 0 : index
    %4 = vector.load %arg16[%c0_4, %c0_5] : memref<8x324xf32, #tpu.memory_space<vmem>>, vector<8x19xf32>
    tpu.vector_store %arg16[%c0_4, %c0_5], %1 {strides = array<i32>} : memref<8x324xf32, #tpu.memory_space<vmem>>, vector<8x19xf32>,
    %c0_6 = arith.constant 0 : index
    %c305_7 = arith.constant 305 : index
    %5 = vector.load %arg16[%c0_6, %c305_7] : memref<8x324xf32, #tpu.memory_space<vmem>>, vector<8x19xf32>
    tpu.vector_store %arg16[%c0_6, %c305_7], %1 {strides = array<i32>} : memref<8x324xf32, #tpu.memory_space<vmem>>, vector<8x19xf32>,
    %c0_8 = arith.constant 0 : index
    %c0_9 = arith.constant 0 : index
    %c0_10 = arith.constant 0 : index
    %6 = vector.load %arg3[%c0_8, %c0_9, %c0_10] : memref<9x16x4xf32, #tpu.memory_space<vmem>>, vector<1x16x4xf32>
    %7 = vector.shape_cast %6 : vector<1x16x4xf32> to vector<16x4xf32>
    %c0_11 = arith.constant 0 : index
    %c0_12 = arith.constant 0 : index
    %c0_13 = arith.constant 0 : index
    %8 = vector.load %arg1[%c0_11, %c0_12, %c0_13] : memref<1x4x324xf32, #tpu.memory_space<vmem>>, vector<1x4x286xf32>
    %9 = vector.shape_cast %8 : vector<1x4x286xf32> to vector<4x286xf32>
    %cst_14 = arith.constant dense<0.000000e+00> : vector<16x286xf32>
    %10 = tpu.matmul %7, %9, %cst_14 {dimension_numbers = #tpu.dot_dimension_numbers<[1], [0], [0], [1], [0, 0, 1, 1], [], []>} : vector<16x4xf32>, vector<4x286xf32>, vector<16x286xf32> -> vector<16x286xf32>
    %c1 = arith.constant 1 : index
    %c0_15 = arith.constant 0 : index
    %c0_16 = arith.constant 0 : index
    %11 = vector.load %arg3[%c1, %c0_15, %c0_16] : memref<9x16x4xf32, #tpu.memory_space<vmem>>, vector<1x16x4xf32>
    %12 = vector.shape_cast %11 : vector<1x16x4xf32> to vector<16x4xf32>
    %c0_17 = arith.constant 0 : index
    %c0_18 = arith.constant 0 : index
    %c1_19 = arith.constant 1 : index
    %13 = vector.load %arg1[%c0_17, %c0_18, %c1_19] : memref<1x4x324xf32, #tpu.memory_space<vmem>>, vector<1x4x286xf32>
    %14 = vector.shape_cast %13 : vector<1x4x286xf32> to vector<4x286xf32>
    %cst_20 = arith.constant dense<0.000000e+00> : vector<16x286xf32>
    %15 = tpu.matmul %12, %14, %cst_20 {dimension_numbers = #tpu.dot_dimension_numbers<[1], [0], [0], [1], [0, 0, 1, 1], [], []>} : vector<16x4xf32>, vector<4x286xf32>, vector<16x286xf32> -> vector<16x286xf32>
    %16 = arith.addf %10, %15 : vector<16x286xf32>
    %c2 = arith.constant 2 : index
    %c0_21 = arith.constant 0 : index
    %c0_22 = arith.constant 0 : index
    %17 = vector.load %arg3[%c2, %c0_21, %c0_22] : memref<9x16x4xf32, #tpu.memory_space<vmem>>, vector<1x16x4xf32>
    %18 = vector.shape_cast %17 : vector<1x16x4xf32> to vector<16x4xf32>
    %c0_23 = arith.constant 0 : index
    %c0_24 = arith.constant 0 : index
    %c2_25 = arith.constant 2 : index
    %19 = vector.load %arg1[%c0_23, %c0_24, %c2_25] : memref<1x4x324xf32, #tpu.memory_space<vmem>>, vector<1x4x286xf32>
    %20 = vector.shape_cast %19 : vector<1x4x286xf32> to vector<4x286xf32>
    %cst_26 = arith.constant dense<0.000000e+00> : vector<16x286xf32>
    %21 = tpu.matmul %18, %20, %cst_26 {dimension_numbers = #tpu.dot_dimension_numbers<[1], [0], [0], [1], [0, 0, 1, 1], [], []>} : vector<16x4xf32>, vector<4x286xf32>, vector<16x286xf32> -> vector<16x286xf32>
    %22 = arith.addf %16, %21 : vector<16x286xf32>
    %c3 = arith.constant 3 : index
    %c0_27 = arith.constant 0 : index
    %c0_28 = arith.constant 0 : index
    %23 = vector.load %arg3[%c3, %c0_27, %c0_28] : memref<9x16x4xf32, #tpu.memory_space<vmem>>, vector<1x16x4xf32>
    %24 = vector.shape_cast %23 : vector<1x16x4xf32> to vector<16x4xf32>
    %c0_29 = arith.constant 0 : index
    %c0_30 = arith.constant 0 : index
    %c18 = arith.constant 18 : index
    %25 = vector.load %arg1[%c0_29, %c0_30, %c18] : memref<1x4x324xf32, #tpu.memory_space<vmem>>, vector<1x4x286xf32>
    %26 = vector.shape_cast %25 : vector<1x4x286xf32> to vector<4x286xf32>
    %cst_31 = arith.constant dense<0.000000e+00> : vector<16x286xf32>
    %27 = tpu.matmul %24, %26, %cst_31 {dimension_numbers = #tpu.dot_dimension_numbers<[1], [0], [0], [1], [0, 0, 1, 1], [], []>} : vector<16x4xf32>, vector<4x286xf32>, vector<16x286xf32> -> vector<16x286xf32>
    %28 = arith.addf %22, %27 : vector<16x286xf32>
    %c4 = arith.constant 4 : index
    %c0_32 = arith.constant 0 : index
    %c0_33 = arith.constant 0 : index
    %29 = vector.load %arg3[%c4, %c0_32, %c0_33] : memref<9x16x4xf32, #tpu.memory_space<vmem>>, vector<1x16x4xf32>
    %30 = vector.shape_cast %29 : vector<1x16x4xf32> to vector<16x4xf32>
    %c0_34 = arith.constant 0 : index
    %c0_35 = arith.constant 0 : index
    %c19 = arith.constant 19 : index
    %31 = vector.load %arg1[%c0_34, %c0_35, %c19] : memref<1x4x324xf32, #tpu.memory_space<vmem>>, vector<1x4x286xf32>
    %32 = vector.shape_cast %31 : vector<1x4x286xf32> to vector<4x286xf32>
    %cst_36 = arith.constant dense<0.000000e+00> : vector<16x286xf32>
    %33 = tpu.matmul %30, %32, %cst_36 {dimension_numbers = #tpu.dot_dimension_numbers<[1], [0], [0], [1], [0, 0, 1, 1], [], []>} : vector<16x4xf32>, vector<4x286xf32>, vector<16x286xf32> -> vector<16x286xf32>
    %34 = arith.addf %28, %33 : vector<16x286xf32>
    %c5 = arith.constant 5 : index
    %c0_37 = arith.constant 0 : index
    %c0_38 = arith.constant 0 : index
    %35 = vector.load %arg3[%c5, %c0_37, %c0_38] : memref<9x16x4xf32, #tpu.memory_space<vmem>>, vector<1x16x4xf32>
    %36 = vector.shape_cast %35 : vector<1x16x4xf32> to vector<16x4xf32>
    %c0_39 = arith.constant 0 : index
    %c0_40 = arith.constant 0 : index
    %c20 = arith.constant 20 : index
    %37 = vector.load %arg1[%c0_39, %c0_40, %c20] : memref<1x4x324xf32, #tpu.memory_space<vmem>>, vector<1x4x286xf32>
    %38 = vector.shape_cast %37 : vector<1x4x286xf32> to vector<4x286xf32>
    %cst_41 = arith.constant dense<0.000000e+00> : vector<16x286xf32>
    %39 = tpu.matmul %36, %38, %cst_41 {dimension_numbers = #tpu.dot_dimension_numbers<[1], [0], [0], [1], [0, 0, 1, 1], [], []>} : vector<16x4xf32>, vector<4x286xf32>, vector<16x286xf32> -> vector<16x286xf32>
    %40 = arith.addf %34, %39 : vector<16x286xf32>
    %c6 = arith.constant 6 : index
    %c0_42 = arith.constant 0 : index
    %c0_43 = arith.constant 0 : index
    %41 = vector.load %arg3[%c6, %c0_42, %c0_43] : memref<9x16x4xf32, #tpu.memory_space<vmem>>, vector<1x16x4xf32>
    %42 = vector.shape_cast %41 : vector<1x16x4xf32> to vector<16x4xf32>
    %c0_44 = arith.constant 0 : index
    %c0_45 = arith.constant 0 : index
    %c36 = arith.constant 36 : index
    %43 = vector.load %arg1[%c0_44, %c0_45, %c36] : memref<1x4x324xf32, #tpu.memory_space<vmem>>, vector<1x4x286xf32>
    %44 = vector.shape_cast %43 : vector<1x4x286xf32> to vector<4x286xf32>
    %cst_46 = arith.constant dense<0.000000e+00> : vector<16x286xf32>
    %45 = tpu.matmul %42, %44, %cst_46 {dimension_numbers = #tpu.dot_dimension_numbers<[1], [0], [0], [1], [0, 0, 1, 1], [], []>} : vector<16x4xf32>, vector<4x286xf32>, vector<16x286xf32> -> vector<16x286xf32>
    %46 = arith.addf %40, %45 : vector<16x286xf32>
    %c7 = arith.constant 7 : index
    %c0_47 = arith.constant 0 : index
    %c0_48 = arith.constant 0 : index
    %47 = vector.load %arg3[%c7, %c0_47, %c0_48] : memref<9x16x4xf32, #tpu.memory_space<vmem>>, vector<1x16x4xf32>
    %48 = vector.shape_cast %47 : vector<1x16x4xf32> to vector<16x4xf32>
    %c0_49 = arith.constant 0 : index
    %c0_50 = arith.constant 0 : index
    %c37 = arith.constant 37 : index
    %49 = vector.load %arg1[%c0_49, %c0_50, %c37] : memref<1x4x324xf32, #tpu.memory_space<vmem>>, vector<1x4x286xf32>
    %50 = vector.shape_cast %49 : vector<1x4x286xf32> to vector<4x286xf32>
    %cst_51 = arith.constant dense<0.000000e+00> : vector<16x286xf32>
    %51 = tpu.matmul %48, %50, %cst_51 {dimension_numbers = #tpu.dot_dimension_numbers<[1], [0], [0], [1], [0, 0, 1, 1], [], []>} : vector<16x4xf32>, vector<4x286xf32>, vector<16x286xf32> -> vector<16x286xf32>
    %52 = arith.addf %46, %51 : vector<16x286xf32>
    %c8 = arith.constant 8 : index
    %c0_52 = arith.constant 0 : index
    %c0_53 = arith.constant 0 : index
    %53 = vector.load %arg3[%c8, %c0_52, %c0_53] : memref<9x16x4xf32, #tpu.memory_space<vmem>>, vector<1x16x4xf32>
    %54 = vector.shape_cast %53 : vector<1x16x4xf32> to vector<16x4xf32>
    %c0_54 = arith.constant 0 : index
    %c0_55 = arith.constant 0 : index
    %c38 = arith.constant 38 : index
    %55 = vector.load %arg1[%c0_54, %c0_55, %c38] : memref<1x4x324xf32, #tpu.memory_space<vmem>>, vector<1x4x286xf32>
    %56 = vector.shape_cast %55 : vector<1x4x286xf32> to vector<4x286xf32>
    %cst_56 = arith.constant dense<0.000000e+00> : vector<16x286xf32>
    %57 = tpu.matmul %54, %56, %cst_56 {dimension_numbers = #tpu.dot_dimension_numbers<[1], [0], [0], [1], [0, 0, 1, 1], [], []>} : vector<16x4xf32>, vector<4x286xf32>, vector<16x286xf32> -> vector<16x286xf32>
    %58 = arith.addf %52, %57 : vector<16x286xf32>
    %c0_57 = arith.constant 0 : index
    %c0_58 = arith.constant 0 : index
    %59 = vector.load %arg4[%c0_57, %c0_58] : memref<16x1xf32, #tpu.memory_space<vmem>>, vector<16x1xf32>
    %60 = vector.broadcast %59 : vector<16x1xf32> to vector<16x286xf32>
    %61 = arith.addf %58, %60 : vector<16x286xf32>
    %cst_59 = arith.constant 0.000000e+00 : f32
    %62 = vector.broadcast %cst_59 : f32 to vector<16x286xf32>
    %63 = arith.maximumf %61, %62 : vector<16x286xf32>
    %64 = vector.broadcast %0 : vector<1x286xf32> to vector<16x286xf32>
    %65 = arith.mulf %63, %64 : vector<16x286xf32>
    %66 = vector.extract_strided_slice %65 {offsets = [0, 0], sizes = [8, 286], strides = [1, 1]} : vector<16x286xf32> to vector<8x286xf32>
    %c0_60 = arith.constant 0 : index
    %c19_61 = arith.constant 19 : index
    %67 = vector.load %arg15[%c0_60, %c19_61] : memref<8x324xf32, #tpu.memory_space<vmem>>, vector<8x286xf32>
    tpu.vector_store %arg15[%c0_60, %c19_61], %66 {strides = array<i32>} : memref<8x324xf32, #tpu.memory_space<vmem>>, vector<8x286xf32>,
    %68 = vector.extract_strided_slice %65 {offsets = [8, 0], sizes = [8, 286], strides = [1, 1]} : vector<16x286xf32> to vector<8x286xf32>
    %c0_62 = arith.constant 0 : index
    %c19_63 = arith.constant 19 : index
    %69 = vector.load %arg16[%c0_62, %c19_63] : memref<8x324xf32, #tpu.memory_space<vmem>>, vector<8x286xf32>
    tpu.vector_store %arg16[%c0_62, %c19_63], %68 {strides = array<i32>} : memref<8x324xf32, #tpu.memory_space<vmem>>, vector<8x286xf32>,
    %c0_64 = arith.constant 0 : index
    %c0_65 = arith.constant 0 : index
    %c0_66 = arith.constant 0 : index
    %70 = vector.load %arg5[%c0_64, %c0_65, %c0_66] : memref<9x8x8xf32, #tpu.memory_space<vmem>>, vector<1x8x8xf32>
    %71 = vector.shape_cast %70 : vector<1x8x8xf32> to vector<8x8xf32>
    %c0_67 = arith.constant 0 : index
    %c0_68 = arith.constant 0 : index
    %72 = vector.load %arg15[%c0_67, %c0_68] : memref<8x324xf32, #tpu.memory_space<vmem>>, vector<8x286xf32>
    %cst_69 = arith.constant dense<0.000000e+00> : vector<8x286xf32>
    %73 = tpu.matmul %71, %72, %cst_69 {dimension_numbers = #tpu.dot_dimension_numbers<[1], [0], [0], [1], [0, 0, 1, 1], [], []>} : vector<8x8xf32>, vector<8x286xf32>, vector<8x286xf32> -> vector<8x286xf32>
    %c1_70 = arith.constant 1 : index
    %c0_71 = arith.constant 0 : index
    %c0_72 = arith.constant 0 : index
    %74 = vector.load %arg5[%c1_70, %c0_71, %c0_72] : memref<9x8x8xf32, #tpu.memory_space<vmem>>, vector<1x8x8xf32>
    %75 = vector.shape_cast %74 : vector<1x8x8xf32> to vector<8x8xf32>
    %c0_73 = arith.constant 0 : index
    %c1_74 = arith.constant 1 : index
    %76 = vector.load %arg15[%c0_73, %c1_74] : memref<8x324xf32, #tpu.memory_space<vmem>>, vector<8x286xf32>
    %cst_75 = arith.constant dense<0.000000e+00> : vector<8x286xf32>
    %77 = tpu.matmul %75, %76, %cst_75 {dimension_numbers = #tpu.dot_dimension_numbers<[1], [0], [0], [1], [0, 0, 1, 1], [], []>} : vector<8x8xf32>, vector<8x286xf32>, vector<8x286xf32> -> vector<8x286xf32>
    %78 = arith.addf %73, %77 : vector<8x286xf32>
    %c2_76 = arith.constant 2 : index
    %c0_77 = arith.constant 0 : index
    %c0_78 = arith.constant 0 : index
    %79 = vector.load %arg5[%c2_76, %c0_77, %c0_78] : memref<9x8x8xf32, #tpu.memory_space<vmem>>, vector<1x8x8xf32>
    %80 = vector.shape_cast %79 : vector<1x8x8xf32> to vector<8x8xf32>
    %c0_79 = arith.constant 0 : index
    %c2_80 = arith.constant 2 : index
    %81 = vector.load %arg15[%c0_79, %c2_80] : memref<8x324xf32, #tpu.memory_space<vmem>>, vector<8x286xf32>
    %cst_81 = arith.constant dense<0.000000e+00> : vector<8x286xf32>
    %82 = tpu.matmul %80, %81, %cst_81 {dimension_numbers = #tpu.dot_dimension_numbers<[1], [0], [0], [1], [0, 0, 1, 1], [], []>} : vector<8x8xf32>, vector<8x286xf32>, vector<8x286xf32> -> vector<8x286xf32>
    %83 = arith.addf %78, %82 : vector<8x286xf32>
    %c3_82 = arith.constant 3 : index
    %c0_83 = arith.constant 0 : index
    %c0_84 = arith.constant 0 : index
    %84 = vector.load %arg5[%c3_82, %c0_83, %c0_84] : memref<9x8x8xf32, #tpu.memory_space<vmem>>, vector<1x8x8xf32>
    %85 = vector.shape_cast %84 : vector<1x8x8xf32> to vector<8x8xf32>
    %c0_85 = arith.constant 0 : index
    %c18_86 = arith.constant 18 : index
    %86 = vector.load %arg15[%c0_85, %c18_86] : memref<8x324xf32, #tpu.memory_space<vmem>>, vector<8x286xf32>
    %cst_87 = arith.constant dense<0.000000e+00> : vector<8x286xf32>
    %87 = tpu.matmul %85, %86, %cst_87 {dimension_numbers = #tpu.dot_dimension_numbers<[1], [0], [0], [1], [0, 0, 1, 1], [], []>} : vector<8x8xf32>, vector<8x286xf32>, vector<8x286xf32> -> vector<8x286xf32>
    %88 = arith.addf %83, %87 : vector<8x286xf32>
    %c4_88 = arith.constant 4 : index
    %c0_89 = arith.constant 0 : index
    %c0_90 = arith.constant 0 : index
    %89 = vector.load %arg5[%c4_88, %c0_89, %c0_90] : memref<9x8x8xf32, #tpu.memory_space<vmem>>, vector<1x8x8xf32>
    %90 = vector.shape_cast %89 : vector<1x8x8xf32> to vector<8x8xf32>
    %c0_91 = arith.constant 0 : index
    %c19_92 = arith.constant 19 : index
    %91 = vector.load %arg15[%c0_91, %c19_92] : memref<8x324xf32, #tpu.memory_space<vmem>>, vector<8x286xf32>
    %cst_93 = arith.constant dense<0.000000e+00> : vector<8x286xf32>
    %92 = tpu.matmul %90, %91, %cst_93 {dimension_numbers = #tpu.dot_dimension_numbers<[1], [0], [0], [1], [0, 0, 1, 1], [], []>} : vector<8x8xf32>, vector<8x286xf32>, vector<8x286xf32> -> vector<8x286xf32>
    %93 = arith.addf %88, %92 : vector<8x286xf32>
    %c5_94 = arith.constant 5 : index
    %c0_95 = arith.constant 0 : index
    %c0_96 = arith.constant 0 : index
    %94 = vector.load %arg5[%c5_94, %c0_95, %c0_96] : memref<9x8x8xf32, #tpu.memory_space<vmem>>, vector<1x8x8xf32>
    %95 = vector.shape_cast %94 : vector<1x8x8xf32> to vector<8x8xf32>
    %c0_97 = arith.constant 0 : index
    %c20_98 = arith.constant 20 : index
    %96 = vector.load %arg15[%c0_97, %c20_98] : memref<8x324xf32, #tpu.memory_space<vmem>>, vector<8x286xf32>
    %cst_99 = arith.constant dense<0.000000e+00> : vector<8x286xf32>
    %97 = tpu.matmul %95, %96, %cst_99 {dimension_numbers = #tpu.dot_dimension_numbers<[1], [0], [0], [1], [0, 0, 1, 1], [], []>} : vector<8x8xf32>, vector<8x286xf32>, vector<8x286xf32> -> vector<8x286xf32>
    %98 = arith.addf %93, %97 : vector<8x286xf32>
    %c6_100 = arith.constant 6 : index
    %c0_101 = arith.constant 0 : index
    %c0_102 = arith.constant 0 : index
    %99 = vector.load %arg5[%c6_100, %c0_101, %c0_102] : memref<9x8x8xf32, #tpu.memory_space<vmem>>, vector<1x8x8xf32>
    %100 = vector.shape_cast %99 : vector<1x8x8xf32> to vector<8x8xf32>
    %c0_103 = arith.constant 0 : index
    %c36_104 = arith.constant 36 : index
    %101 = vector.load %arg15[%c0_103, %c36_104] : memref<8x324xf32, #tpu.memory_space<vmem>>, vector<8x286xf32>
    %cst_105 = arith.constant dense<0.000000e+00> : vector<8x286xf32>
    %102 = tpu.matmul %100, %101, %cst_105 {dimension_numbers = #tpu.dot_dimension_numbers<[1], [0], [0], [1], [0, 0, 1, 1], [], []>} : vector<8x8xf32>, vector<8x286xf32>, vector<8x286xf32> -> vector<8x286xf32>
    %103 = arith.addf %98, %102 : vector<8x286xf32>
    %c7_106 = arith.constant 7 : index
    %c0_107 = arith.constant 0 : index
    %c0_108 = arith.constant 0 : index
    %104 = vector.load %arg5[%c7_106, %c0_107, %c0_108] : memref<9x8x8xf32, #tpu.memory_space<vmem>>, vector<1x8x8xf32>
    %105 = vector.shape_cast %104 : vector<1x8x8xf32> to vector<8x8xf32>
    %c0_109 = arith.constant 0 : index
    %c37_110 = arith.constant 37 : index
    %106 = vector.load %arg15[%c0_109, %c37_110] : memref<8x324xf32, #tpu.memory_space<vmem>>, vector<8x286xf32>
    %cst_111 = arith.constant dense<0.000000e+00> : vector<8x286xf32>
    %107 = tpu.matmul %105, %106, %cst_111 {dimension_numbers = #tpu.dot_dimension_numbers<[1], [0], [0], [1], [0, 0, 1, 1], [], []>} : vector<8x8xf32>, vector<8x286xf32>, vector<8x286xf32> -> vector<8x286xf32>
    %108 = arith.addf %103, %107 : vector<8x286xf32>
    %c8_112 = arith.constant 8 : index
    %c0_113 = arith.constant 0 : index
    %c0_114 = arith.constant 0 : index
    %109 = vector.load %arg5[%c8_112, %c0_113, %c0_114] : memref<9x8x8xf32, #tpu.memory_space<vmem>>, vector<1x8x8xf32>
    %110 = vector.shape_cast %109 : vector<1x8x8xf32> to vector<8x8xf32>
    %c0_115 = arith.constant 0 : index
    %c38_116 = arith.constant 38 : index
    %111 = vector.load %arg15[%c0_115, %c38_116] : memref<8x324xf32, #tpu.memory_space<vmem>>, vector<8x286xf32>
    %cst_117 = arith.constant dense<0.000000e+00> : vector<8x286xf32>
    %112 = tpu.matmul %110, %111, %cst_117 {dimension_numbers = #tpu.dot_dimension_numbers<[1], [0], [0], [1], [0, 0, 1, 1], [], []>} : vector<8x8xf32>, vector<8x286xf32>, vector<8x286xf32> -> vector<8x286xf32>
    %113 = arith.addf %108, %112 : vector<8x286xf32>
    %c0_118 = arith.constant 0 : index
    %c0_119 = arith.constant 0 : index
    %114 = vector.load %arg6[%c0_118, %c0_119] : memref<8x1xf32, #tpu.memory_space<vmem>>, vector<8x1xf32>
    %115 = vector.broadcast %114 : vector<8x1xf32> to vector<8x286xf32>
    %116 = arith.addf %113, %115 : vector<8x286xf32>
    %cst_120 = arith.constant 0.000000e+00 : f32
    %117 = vector.broadcast %cst_120 : f32 to vector<8x286xf32>
    %118 = arith.maximumf %116, %117 : vector<8x286xf32>
    %119 = vector.broadcast %0 : vector<1x286xf32> to vector<8x286xf32>
    %120 = arith.mulf %118, %119 : vector<8x286xf32>
    %c0_121 = arith.constant 0 : index
    %c19_122 = arith.constant 19 : index
    %121 = vector.load %arg15[%c0_121, %c19_122] : memref<8x324xf32, #tpu.memory_space<vmem>>, vector<8x286xf32>
    tpu.vector_store %arg15[%c0_121, %c19_122], %120 {strides = array<i32>} : memref<8x324xf32, #tpu.memory_space<vmem>>, vector<8x286xf32>,
    %c0_123 = arith.constant 0 : index
    %c0_124 = arith.constant 0 : index
    %c0_125 = arith.constant 0 : index
    %122 = vector.load %arg7[%c0_123, %c0_124, %c0_125] : memref<9x8x8xf32, #tpu.memory_space<vmem>>, vector<1x8x8xf32>
    %123 = vector.shape_cast %122 : vector<1x8x8xf32> to vector<8x8xf32>
    %c0_126 = arith.constant 0 : index
    %c0_127 = arith.constant 0 : index
    %124 = vector.load %arg16[%c0_126, %c0_127] : memref<8x324xf32, #tpu.memory_space<vmem>>, vector<8x286xf32>
    %cst_128 = arith.constant dense<0.000000e+00> : vector<8x286xf32>
    %125 = tpu.matmul %123, %124, %cst_128 {dimension_numbers = #tpu.dot_dimension_numbers<[1], [0], [0], [1], [0, 0, 1, 1], [], []>} : vector<8x8xf32>, vector<8x286xf32>, vector<8x286xf32> -> vector<8x286xf32>
    %c1_129 = arith.constant 1 : index
    %c0_130 = arith.constant 0 : index
    %c0_131 = arith.constant 0 : index
    %126 = vector.load %arg7[%c1_129, %c0_130, %c0_131] : memref<9x8x8xf32, #tpu.memory_space<vmem>>, vector<1x8x8xf32>
    %127 = vector.shape_cast %126 : vector<1x8x8xf32> to vector<8x8xf32>
    %c0_132 = arith.constant 0 : index
    %c1_133 = arith.constant 1 : index
    %128 = vector.load %arg16[%c0_132, %c1_133] : memref<8x324xf32, #tpu.memory_space<vmem>>, vector<8x286xf32>
    %cst_134 = arith.constant dense<0.000000e+00> : vector<8x286xf32>
    %129 = tpu.matmul %127, %128, %cst_134 {dimension_numbers = #tpu.dot_dimension_numbers<[1], [0], [0], [1], [0, 0, 1, 1], [], []>} : vector<8x8xf32>, vector<8x286xf32>, vector<8x286xf32> -> vector<8x286xf32>
    %130 = arith.addf %125, %129 : vector<8x286xf32>
    %c2_135 = arith.constant 2 : index
    %c0_136 = arith.constant 0 : index
    %c0_137 = arith.constant 0 : index
    %131 = vector.load %arg7[%c2_135, %c0_136, %c0_137] : memref<9x8x8xf32, #tpu.memory_space<vmem>>, vector<1x8x8xf32>
    %132 = vector.shape_cast %131 : vector<1x8x8xf32> to vector<8x8xf32>
    %c0_138 = arith.constant 0 : index
    %c2_139 = arith.constant 2 : index
    %133 = vector.load %arg16[%c0_138, %c2_139] : memref<8x324xf32, #tpu.memory_space<vmem>>, vector<8x286xf32>
    %cst_140 = arith.constant dense<0.000000e+00> : vector<8x286xf32>
    %134 = tpu.matmul %132, %133, %cst_140 {dimension_numbers = #tpu.dot_dimension_numbers<[1], [0], [0], [1], [0, 0, 1, 1], [], []>} : vector<8x8xf32>, vector<8x286xf32>, vector<8x286xf32> -> vector<8x286xf32>
    %135 = arith.addf %130, %134 : vector<8x286xf32>
    %c3_141 = arith.constant 3 : index
    %c0_142 = arith.constant 0 : index
    %c0_143 = arith.constant 0 : index
    %136 = vector.load %arg7[%c3_141, %c0_142, %c0_143] : memref<9x8x8xf32, #tpu.memory_space<vmem>>, vector<1x8x8xf32>
    %137 = vector.shape_cast %136 : vector<1x8x8xf32> to vector<8x8xf32>
    %c0_144 = arith.constant 0 : index
    %c18_145 = arith.constant 18 : index
    %138 = vector.load %arg16[%c0_144, %c18_145] : memref<8x324xf32, #tpu.memory_space<vmem>>, vector<8x286xf32>
    %cst_146 = arith.constant dense<0.000000e+00> : vector<8x286xf32>
    %139 = tpu.matmul %137, %138, %cst_146 {dimension_numbers = #tpu.dot_dimension_numbers<[1], [0], [0], [1], [0, 0, 1, 1], [], []>} : vector<8x8xf32>, vector<8x286xf32>, vector<8x286xf32> -> vector<8x286xf32>
    %140 = arith.addf %135, %139 : vector<8x286xf32>
    %c4_147 = arith.constant 4 : index
    %c0_148 = arith.constant 0 : index
    %c0_149 = arith.constant 0 : index
    %141 = vector.load %arg7[%c4_147, %c0_148, %c0_149] : memref<9x8x8xf32, #tpu.memory_space<vmem>>, vector<1x8x8xf32>
    %142 = vector.shape_cast %141 : vector<1x8x8xf32> to vector<8x8xf32>
    %c0_150 = arith.constant 0 : index
    %c19_151 = arith.constant 19 : index
    %143 = vector.load %arg16[%c0_150, %c19_151] : memref<8x324xf32, #tpu.memory_space<vmem>>, vector<8x286xf32>
    %cst_152 = arith.constant dense<0.000000e+00> : vector<8x286xf32>
    %144 = tpu.matmul %142, %143, %cst_152 {dimension_numbers = #tpu.dot_dimension_numbers<[1], [0], [0], [1], [0, 0, 1, 1], [], []>} : vector<8x8xf32>, vector<8x286xf32>, vector<8x286xf32> -> vector<8x286xf32>
    %145 = arith.addf %140, %144 : vector<8x286xf32>
    %c5_153 = arith.constant 5 : index
    %c0_154 = arith.constant 0 : index
    %c0_155 = arith.constant 0 : index
    %146 = vector.load %arg7[%c5_153, %c0_154, %c0_155] : memref<9x8x8xf32, #tpu.memory_space<vmem>>, vector<1x8x8xf32>
    %147 = vector.shape_cast %146 : vector<1x8x8xf32> to vector<8x8xf32>
    %c0_156 = arith.constant 0 : index
    %c20_157 = arith.constant 20 : index
    %148 = vector.load %arg16[%c0_156, %c20_157] : memref<8x324xf32, #tpu.memory_space<vmem>>, vector<8x286xf32>
    %cst_158 = arith.constant dense<0.000000e+00> : vector<8x286xf32>
    %149 = tpu.matmul %147, %148, %cst_158 {dimension_numbers = #tpu.dot_dimension_numbers<[1], [0], [0], [1], [0, 0, 1, 1], [], []>} : vector<8x8xf32>, vector<8x286xf32>, vector<8x286xf32> -> vector<8x286xf32>
    %150 = arith.addf %145, %149 : vector<8x286xf32>
    %c6_159 = arith.constant 6 : index
    %c0_160 = arith.constant 0 : index
    %c0_161 = arith.constant 0 : index
    %151 = vector.load %arg7[%c6_159, %c0_160, %c0_161] : memref<9x8x8xf32, #tpu.memory_space<vmem>>, vector<1x8x8xf32>
    %152 = vector.shape_cast %151 : vector<1x8x8xf32> to vector<8x8xf32>
    %c0_162 = arith.constant 0 : index
    %c36_163 = arith.constant 36 : index
    %153 = vector.load %arg16[%c0_162, %c36_163] : memref<8x324xf32, #tpu.memory_space<vmem>>, vector<8x286xf32>
    %cst_164 = arith.constant dense<0.000000e+00> : vector<8x286xf32>
    %154 = tpu.matmul %152, %153, %cst_164 {dimension_numbers = #tpu.dot_dimension_numbers<[1], [0], [0], [1], [0, 0, 1, 1], [], []>} : vector<8x8xf32>, vector<8x286xf32>, vector<8x286xf32> -> vector<8x286xf32>
    %155 = arith.addf %150, %154 : vector<8x286xf32>
    %c7_165 = arith.constant 7 : index
    %c0_166 = arith.constant 0 : index
    %c0_167 = arith.constant 0 : index
    %156 = vector.load %arg7[%c7_165, %c0_166, %c0_167] : memref<9x8x8xf32, #tpu.memory_space<vmem>>, vector<1x8x8xf32>
    %157 = vector.shape_cast %156 : vector<1x8x8xf32> to vector<8x8xf32>
    %c0_168 = arith.constant 0 : index
    %c37_169 = arith.constant 37 : index
    %158 = vector.load %arg16[%c0_168, %c37_169] : memref<8x324xf32, #tpu.memory_space<vmem>>, vector<8x286xf32>
    %cst_170 = arith.constant dense<0.000000e+00> : vector<8x286xf32>
    %159 = tpu.matmul %157, %158, %cst_170 {dimension_numbers = #tpu.dot_dimension_numbers<[1], [0], [0], [1], [0, 0, 1, 1], [], []>} : vector<8x8xf32>, vector<8x286xf32>, vector<8x286xf32> -> vector<8x286xf32>
    %160 = arith.addf %155, %159 : vector<8x286xf32>
    %c8_171 = arith.constant 8 : index
    %c0_172 = arith.constant 0 : index
    %c0_173 = arith.constant 0 : index
    %161 = vector.load %arg7[%c8_171, %c0_172, %c0_173] : memref<9x8x8xf32, #tpu.memory_space<vmem>>, vector<1x8x8xf32>
    %162 = vector.shape_cast %161 : vector<1x8x8xf32> to vector<8x8xf32>
    %c0_174 = arith.constant 0 : index
    %c38_175 = arith.constant 38 : index
    %163 = vector.load %arg16[%c0_174, %c38_175] : memref<8x324xf32, #tpu.memory_space<vmem>>, vector<8x286xf32>
    %cst_176 = arith.constant dense<0.000000e+00> : vector<8x286xf32>
    %164 = tpu.matmul %162, %163, %cst_176 {dimension_numbers = #tpu.dot_dimension_numbers<[1], [0], [0], [1], [0, 0, 1, 1], [], []>} : vector<8x8xf32>, vector<8x286xf32>, vector<8x286xf32> -> vector<8x286xf32>
    %165 = arith.addf %160, %164 : vector<8x286xf32>
    %c0_177 = arith.constant 0 : index
    %c0_178 = arith.constant 0 : index
    %166 = vector.load %arg8[%c0_177, %c0_178] : memref<8x1xf32, #tpu.memory_space<vmem>>, vector<8x1xf32>
    %167 = vector.broadcast %166 : vector<8x1xf32> to vector<8x286xf32>
    %168 = arith.addf %165, %167 : vector<8x286xf32>
    %cst_179 = arith.constant 0.000000e+00 : f32
    %169 = vector.broadcast %cst_179 : f32 to vector<8x286xf32>
    %170 = arith.maximumf %168, %169 : vector<8x286xf32>
    %171 = vector.broadcast %0 : vector<1x286xf32> to vector<8x286xf32>
    %172 = arith.mulf %170, %171 : vector<8x286xf32>
    %c0_180 = arith.constant 0 : index
    %c19_181 = arith.constant 19 : index
    %173 = vector.load %arg16[%c0_180, %c19_181] : memref<8x324xf32, #tpu.memory_space<vmem>>, vector<8x286xf32>
    tpu.vector_store %arg16[%c0_180, %c19_181], %172 {strides = array<i32>} : memref<8x324xf32, #tpu.memory_space<vmem>>, vector<8x286xf32>,
    %c0_182 = arith.constant 0 : index
    %c0_183 = arith.constant 0 : index
    %c0_184 = arith.constant 0 : index
    %174 = vector.load %arg9[%c0_182, %c0_183, %c0_184] : memref<9x4x8xf32, #tpu.memory_space<vmem>>, vector<1x4x8xf32>
    %175 = vector.shape_cast %174 : vector<1x4x8xf32> to vector<4x8xf32>
    %c0_185 = arith.constant 0 : index
    %c0_186 = arith.constant 0 : index
    %176 = vector.load %arg15[%c0_185, %c0_186] : memref<8x324xf32, #tpu.memory_space<vmem>>, vector<8x286xf32>
    %cst_187 = arith.constant dense<0.000000e+00> : vector<4x286xf32>
    %177 = tpu.matmul %175, %176, %cst_187 {dimension_numbers = #tpu.dot_dimension_numbers<[1], [0], [0], [1], [0, 0, 1, 1], [], []>} : vector<4x8xf32>, vector<8x286xf32>, vector<4x286xf32> -> vector<4x286xf32>
    %c1_188 = arith.constant 1 : index
    %c0_189 = arith.constant 0 : index
    %c0_190 = arith.constant 0 : index
    %178 = vector.load %arg9[%c1_188, %c0_189, %c0_190] : memref<9x4x8xf32, #tpu.memory_space<vmem>>, vector<1x4x8xf32>
    %179 = vector.shape_cast %178 : vector<1x4x8xf32> to vector<4x8xf32>
    %c0_191 = arith.constant 0 : index
    %c1_192 = arith.constant 1 : index
    %180 = vector.load %arg15[%c0_191, %c1_192] : memref<8x324xf32, #tpu.memory_space<vmem>>, vector<8x286xf32>
    %cst_193 = arith.constant dense<0.000000e+00> : vector<4x286xf32>
    %181 = tpu.matmul %179, %180, %cst_193 {dimension_numbers = #tpu.dot_dimension_numbers<[1], [0], [0], [1], [0, 0, 1, 1], [], []>} : vector<4x8xf32>, vector<8x286xf32>, vector<4x286xf32> -> vector<4x286xf32>
    %182 = arith.addf %177, %181 : vector<4x286xf32>
    %c2_194 = arith.constant 2 : index
    %c0_195 = arith.constant 0 : index
    %c0_196 = arith.constant 0 : index
    %183 = vector.load %arg9[%c2_194, %c0_195, %c0_196] : memref<9x4x8xf32, #tpu.memory_space<vmem>>, vector<1x4x8xf32>
    %184 = vector.shape_cast %183 : vector<1x4x8xf32> to vector<4x8xf32>
    %c0_197 = arith.constant 0 : index
    %c2_198 = arith.constant 2 : index
    %185 = vector.load %arg15[%c0_197, %c2_198] : memref<8x324xf32, #tpu.memory_space<vmem>>, vector<8x286xf32>
    %cst_199 = arith.constant dense<0.000000e+00> : vector<4x286xf32>
    %186 = tpu.matmul %184, %185, %cst_199 {dimension_numbers = #tpu.dot_dimension_numbers<[1], [0], [0], [1], [0, 0, 1, 1], [], []>} : vector<4x8xf32>, vector<8x286xf32>, vector<4x286xf32> -> vector<4x286xf32>
    %187 = arith.addf %182, %186 : vector<4x286xf32>
    %c3_200 = arith.constant 3 : index
    %c0_201 = arith.constant 0 : index
    %c0_202 = arith.constant 0 : index
    %188 = vector.load %arg9[%c3_200, %c0_201, %c0_202] : memref<9x4x8xf32, #tpu.memory_space<vmem>>, vector<1x4x8xf32>
    %189 = vector.shape_cast %188 : vector<1x4x8xf32> to vector<4x8xf32>
    %c0_203 = arith.constant 0 : index
    %c18_204 = arith.constant 18 : index
    %190 = vector.load %arg15[%c0_203, %c18_204] : memref<8x324xf32, #tpu.memory_space<vmem>>, vector<8x286xf32>
    %cst_205 = arith.constant dense<0.000000e+00> : vector<4x286xf32>
    %191 = tpu.matmul %189, %190, %cst_205 {dimension_numbers = #tpu.dot_dimension_numbers<[1], [0], [0], [1], [0, 0, 1, 1], [], []>} : vector<4x8xf32>, vector<8x286xf32>, vector<4x286xf32> -> vector<4x286xf32>
    %192 = arith.addf %187, %191 : vector<4x286xf32>
    %c4_206 = arith.constant 4 : index
    %c0_207 = arith.constant 0 : index
    %c0_208 = arith.constant 0 : index
    %193 = vector.load %arg9[%c4_206, %c0_207, %c0_208] : memref<9x4x8xf32, #tpu.memory_space<vmem>>, vector<1x4x8xf32>
    %194 = vector.shape_cast %193 : vector<1x4x8xf32> to vector<4x8xf32>
    %c0_209 = arith.constant 0 : index
    %c19_210 = arith.constant 19 : index
    %195 = vector.load %arg15[%c0_209, %c19_210] : memref<8x324xf32, #tpu.memory_space<vmem>>, vector<8x286xf32>
    %cst_211 = arith.constant dense<0.000000e+00> : vector<4x286xf32>
    %196 = tpu.matmul %194, %195, %cst_211 {dimension_numbers = #tpu.dot_dimension_numbers<[1], [0], [0], [1], [0, 0, 1, 1], [], []>} : vector<4x8xf32>, vector<8x286xf32>, vector<4x286xf32> -> vector<4x286xf32>
    %197 = arith.addf %192, %196 : vector<4x286xf32>
    %c5_212 = arith.constant 5 : index
    %c0_213 = arith.constant 0 : index
    %c0_214 = arith.constant 0 : index
    %198 = vector.load %arg9[%c5_212, %c0_213, %c0_214] : memref<9x4x8xf32, #tpu.memory_space<vmem>>, vector<1x4x8xf32>
    %199 = vector.shape_cast %198 : vector<1x4x8xf32> to vector<4x8xf32>
    %c0_215 = arith.constant 0 : index
    %c20_216 = arith.constant 20 : index
    %200 = vector.load %arg15[%c0_215, %c20_216] : memref<8x324xf32, #tpu.memory_space<vmem>>, vector<8x286xf32>
    %cst_217 = arith.constant dense<0.000000e+00> : vector<4x286xf32>
    %201 = tpu.matmul %199, %200, %cst_217 {dimension_numbers = #tpu.dot_dimension_numbers<[1], [0], [0], [1], [0, 0, 1, 1], [], []>} : vector<4x8xf32>, vector<8x286xf32>, vector<4x286xf32> -> vector<4x286xf32>
    %202 = arith.addf %197, %201 : vector<4x286xf32>
    %c6_218 = arith.constant 6 : index
    %c0_219 = arith.constant 0 : index
    %c0_220 = arith.constant 0 : index
    %203 = vector.load %arg9[%c6_218, %c0_219, %c0_220] : memref<9x4x8xf32, #tpu.memory_space<vmem>>, vector<1x4x8xf32>
    %204 = vector.shape_cast %203 : vector<1x4x8xf32> to vector<4x8xf32>
    %c0_221 = arith.constant 0 : index
    %c36_222 = arith.constant 36 : index
    %205 = vector.load %arg15[%c0_221, %c36_222] : memref<8x324xf32, #tpu.memory_space<vmem>>, vector<8x286xf32>
    %cst_223 = arith.constant dense<0.000000e+00> : vector<4x286xf32>
    %206 = tpu.matmul %204, %205, %cst_223 {dimension_numbers = #tpu.dot_dimension_numbers<[1], [0], [0], [1], [0, 0, 1, 1], [], []>} : vector<4x8xf32>, vector<8x286xf32>, vector<4x286xf32> -> vector<4x286xf32>
    %207 = arith.addf %202, %206 : vector<4x286xf32>
    %c7_224 = arith.constant 7 : index
    %c0_225 = arith.constant 0 : index
    %c0_226 = arith.constant 0 : index
    %208 = vector.load %arg9[%c7_224, %c0_225, %c0_226] : memref<9x4x8xf32, #tpu.memory_space<vmem>>, vector<1x4x8xf32>
    %209 = vector.shape_cast %208 : vector<1x4x8xf32> to vector<4x8xf32>
    %c0_227 = arith.constant 0 : index
    %c37_228 = arith.constant 37 : index
    %210 = vector.load %arg15[%c0_227, %c37_228] : memref<8x324xf32, #tpu.memory_space<vmem>>, vector<8x286xf32>
    %cst_229 = arith.constant dense<0.000000e+00> : vector<4x286xf32>
    %211 = tpu.matmul %209, %210, %cst_229 {dimension_numbers = #tpu.dot_dimension_numbers<[1], [0], [0], [1], [0, 0, 1, 1], [], []>} : vector<4x8xf32>, vector<8x286xf32>, vector<4x286xf32> -> vector<4x286xf32>
    %212 = arith.addf %207, %211 : vector<4x286xf32>
    %c8_230 = arith.constant 8 : index
    %c0_231 = arith.constant 0 : index
    %c0_232 = arith.constant 0 : index
    %213 = vector.load %arg9[%c8_230, %c0_231, %c0_232] : memref<9x4x8xf32, #tpu.memory_space<vmem>>, vector<1x4x8xf32>
    %214 = vector.shape_cast %213 : vector<1x4x8xf32> to vector<4x8xf32>
    %c0_233 = arith.constant 0 : index
    %c38_234 = arith.constant 38 : index
    %215 = vector.load %arg15[%c0_233, %c38_234] : memref<8x324xf32, #tpu.memory_space<vmem>>, vector<8x286xf32>
    %cst_235 = arith.constant dense<0.000000e+00> : vector<4x286xf32>
    %216 = tpu.matmul %214, %215, %cst_235 {dimension_numbers = #tpu.dot_dimension_numbers<[1], [0], [0], [1], [0, 0, 1, 1], [], []>} : vector<4x8xf32>, vector<8x286xf32>, vector<4x286xf32> -> vector<4x286xf32>
    %217 = arith.addf %212, %216 : vector<4x286xf32>
    %c0_236 = arith.constant 0 : index
    %c0_237 = arith.constant 0 : index
    %218 = vector.load %arg10[%c0_236, %c0_237] : memref<4x1xf32, #tpu.memory_space<vmem>>, vector<4x1xf32>
    %219 = vector.broadcast %218 : vector<4x1xf32> to vector<4x286xf32>
    %220 = arith.addf %217, %219 : vector<4x286xf32>
    %c0_238 = arith.constant 0 : index
    %c0_239 = arith.constant 0 : index
    %c0_240 = arith.constant 0 : index
    %221 = vector.load %arg13[%c0_238, %c0_239, %c0_240] : memref<1x4x286xf32, #tpu.memory_space<vmem>>, vector<1x4x286xf32>
    %222 = vector.shape_cast %221 : vector<1x4x286xf32> to vector<4x286xf32>
    %223 = vector.shape_cast %220 : vector<4x286xf32> to vector<1x4x286xf32>
    tpu.vector_store %arg13[%c0_238, %c0_239, %c0_240], %223 {strides = array<i32>} : memref<1x4x286xf32, #tpu.memory_space<vmem>>, vector<1x4x286xf32>,
    %c0_241 = arith.constant 0 : index
    %c0_242 = arith.constant 0 : index
    %c0_243 = arith.constant 0 : index
    %224 = vector.load %arg11[%c0_241, %c0_242, %c0_243] : memref<9x4x8xf32, #tpu.memory_space<vmem>>, vector<1x4x8xf32>
    %225 = vector.shape_cast %224 : vector<1x4x8xf32> to vector<4x8xf32>
    %c0_244 = arith.constant 0 : index
    %c0_245 = arith.constant 0 : index
    %226 = vector.load %arg16[%c0_244, %c0_245] : memref<8x324xf32, #tpu.memory_space<vmem>>, vector<8x286xf32>
    %cst_246 = arith.constant dense<0.000000e+00> : vector<4x286xf32>
    %227 = tpu.matmul %225, %226, %cst_246 {dimension_numbers = #tpu.dot_dimension_numbers<[1], [0], [0], [1], [0, 0, 1, 1], [], []>} : vector<4x8xf32>, vector<8x286xf32>, vector<4x286xf32> -> vector<4x286xf32>
    %c1_247 = arith.constant 1 : index
    %c0_248 = arith.constant 0 : index
    %c0_249 = arith.constant 0 : index
    %228 = vector.load %arg11[%c1_247, %c0_248, %c0_249] : memref<9x4x8xf32, #tpu.memory_space<vmem>>, vector<1x4x8xf32>
    %229 = vector.shape_cast %228 : vector<1x4x8xf32> to vector<4x8xf32>
    %c0_250 = arith.constant 0 : index
    %c1_251 = arith.constant 1 : index
    %230 = vector.load %arg16[%c0_250, %c1_251] : memref<8x324xf32, #tpu.memory_space<vmem>>, vector<8x286xf32>
    %cst_252 = arith.constant dense<0.000000e+00> : vector<4x286xf32>
    %231 = tpu.matmul %229, %230, %cst_252 {dimension_numbers = #tpu.dot_dimension_numbers<[1], [0], [0], [1], [0, 0, 1, 1], [], []>} : vector<4x8xf32>, vector<8x286xf32>, vector<4x286xf32> -> vector<4x286xf32>
    %232 = arith.addf %227, %231 : vector<4x286xf32>
    %c2_253 = arith.constant 2 : index
    %c0_254 = arith.constant 0 : index
    %c0_255 = arith.constant 0 : index
    %233 = vector.load %arg11[%c2_253, %c0_254, %c0_255] : memref<9x4x8xf32, #tpu.memory_space<vmem>>, vector<1x4x8xf32>
    %234 = vector.shape_cast %233 : vector<1x4x8xf32> to vector<4x8xf32>
    %c0_256 = arith.constant 0 : index
    %c2_257 = arith.constant 2 : index
    %235 = vector.load %arg16[%c0_256, %c2_257] : memref<8x324xf32, #tpu.memory_space<vmem>>, vector<8x286xf32>
    %cst_258 = arith.constant dense<0.000000e+00> : vector<4x286xf32>
    %236 = tpu.matmul %234, %235, %cst_258 {dimension_numbers = #tpu.dot_dimension_numbers<[1], [0], [0], [1], [0, 0, 1, 1], [], []>} : vector<4x8xf32>, vector<8x286xf32>, vector<4x286xf32> -> vector<4x286xf32>
    %237 = arith.addf %232, %236 : vector<4x286xf32>
    %c3_259 = arith.constant 3 : index
    %c0_260 = arith.constant 0 : index
    %c0_261 = arith.constant 0 : index
    %238 = vector.load %arg11[%c3_259, %c0_260, %c0_261] : memref<9x4x8xf32, #tpu.memory_space<vmem>>, vector<1x4x8xf32>
    %239 = vector.shape_cast %238 : vector<1x4x8xf32> to vector<4x8xf32>
    %c0_262 = arith.constant 0 : index
    %c18_263 = arith.constant 18 : index
    %240 = vector.load %arg16[%c0_262, %c18_263] : memref<8x324xf32, #tpu.memory_space<vmem>>, vector<8x286xf32>
    %cst_264 = arith.constant dense<0.000000e+00> : vector<4x286xf32>
    %241 = tpu.matmul %239, %240, %cst_264 {dimension_numbers = #tpu.dot_dimension_numbers<[1], [0], [0], [1], [0, 0, 1, 1], [], []>} : vector<4x8xf32>, vector<8x286xf32>, vector<4x286xf32> -> vector<4x286xf32>
    %242 = arith.addf %237, %241 : vector<4x286xf32>
    %c4_265 = arith.constant 4 : index
    %c0_266 = arith.constant 0 : index
    %c0_267 = arith.constant 0 : index
    %243 = vector.load %arg11[%c4_265, %c0_266, %c0_267] : memref<9x4x8xf32, #tpu.memory_space<vmem>>, vector<1x4x8xf32>
    %244 = vector.shape_cast %243 : vector<1x4x8xf32> to vector<4x8xf32>
    %c0_268 = arith.constant 0 : index
    %c19_269 = arith.constant 19 : index
    %245 = vector.load %arg16[%c0_268, %c19_269] : memref<8x324xf32, #tpu.memory_space<vmem>>, vector<8x286xf32>
    %cst_270 = arith.constant dense<0.000000e+00> : vector<4x286xf32>
    %246 = tpu.matmul %244, %245, %cst_270 {dimension_numbers = #tpu.dot_dimension_numbers<[1], [0], [0], [1], [0, 0, 1, 1], [], []>} : vector<4x8xf32>, vector<8x286xf32>, vector<4x286xf32> -> vector<4x286xf32>
    %247 = arith.addf %242, %246 : vector<4x286xf32>
    %c5_271 = arith.constant 5 : index
    %c0_272 = arith.constant 0 : index
    %c0_273 = arith.constant 0 : index
    %248 = vector.load %arg11[%c5_271, %c0_272, %c0_273] : memref<9x4x8xf32, #tpu.memory_space<vmem>>, vector<1x4x8xf32>
    %249 = vector.shape_cast %248 : vector<1x4x8xf32> to vector<4x8xf32>
    %c0_274 = arith.constant 0 : index
    %c20_275 = arith.constant 20 : index
    %250 = vector.load %arg16[%c0_274, %c20_275] : memref<8x324xf32, #tpu.memory_space<vmem>>, vector<8x286xf32>
    %cst_276 = arith.constant dense<0.000000e+00> : vector<4x286xf32>
    %251 = tpu.matmul %249, %250, %cst_276 {dimension_numbers = #tpu.dot_dimension_numbers<[1], [0], [0], [1], [0, 0, 1, 1], [], []>} : vector<4x8xf32>, vector<8x286xf32>, vector<4x286xf32> -> vector<4x286xf32>
    %252 = arith.addf %247, %251 : vector<4x286xf32>
    %c6_277 = arith.constant 6 : index
    %c0_278 = arith.constant 0 : index
    %c0_279 = arith.constant 0 : index
    %253 = vector.load %arg11[%c6_277, %c0_278, %c0_279] : memref<9x4x8xf32, #tpu.memory_space<vmem>>, vector<1x4x8xf32>
    %254 = vector.shape_cast %253 : vector<1x4x8xf32> to vector<4x8xf32>
    %c0_280 = arith.constant 0 : index
    %c36_281 = arith.constant 36 : index
    %255 = vector.load %arg16[%c0_280, %c36_281] : memref<8x324xf32, #tpu.memory_space<vmem>>, vector<8x286xf32>
    %cst_282 = arith.constant dense<0.000000e+00> : vector<4x286xf32>
    %256 = tpu.matmul %254, %255, %cst_282 {dimension_numbers = #tpu.dot_dimension_numbers<[1], [0], [0], [1], [0, 0, 1, 1], [], []>} : vector<4x8xf32>, vector<8x286xf32>, vector<4x286xf32> -> vector<4x286xf32>
    %257 = arith.addf %252, %256 : vector<4x286xf32>
    %c7_283 = arith.constant 7 : index
    %c0_284 = arith.constant 0 : index
    %c0_285 = arith.constant 0 : index
    %258 = vector.load %arg11[%c7_283, %c0_284, %c0_285] : memref<9x4x8xf32, #tpu.memory_space<vmem>>, vector<1x4x8xf32>
    %259 = vector.shape_cast %258 : vector<1x4x8xf32> to vector<4x8xf32>
    %c0_286 = arith.constant 0 : index
    %c37_287 = arith.constant 37 : index
    %260 = vector.load %arg16[%c0_286, %c37_287] : memref<8x324xf32, #tpu.memory_space<vmem>>, vector<8x286xf32>
    %cst_288 = arith.constant dense<0.000000e+00> : vector<4x286xf32>
    %261 = tpu.matmul %259, %260, %cst_288 {dimension_numbers = #tpu.dot_dimension_numbers<[1], [0], [0], [1], [0, 0, 1, 1], [], []>} : vector<4x8xf32>, vector<8x286xf32>, vector<4x286xf32> -> vector<4x286xf32>
    %262 = arith.addf %257, %261 : vector<4x286xf32>
    %c8_289 = arith.constant 8 : index
    %c0_290 = arith.constant 0 : index
    %c0_291 = arith.constant 0 : index
    %263 = vector.load %arg11[%c8_289, %c0_290, %c0_291] : memref<9x4x8xf32, #tpu.memory_space<vmem>>, vector<1x4x8xf32>
    %264 = vector.shape_cast %263 : vector<1x4x8xf32> to vector<4x8xf32>
    %c0_292 = arith.constant 0 : index
    %c38_293 = arith.constant 38 : index
    %265 = vector.load %arg16[%c0_292, %c38_293] : memref<8x324xf32, #tpu.memory_space<vmem>>, vector<8x286xf32>
    %cst_294 = arith.constant dense<0.000000e+00> : vector<4x286xf32>
    %266 = tpu.matmul %264, %265, %cst_294 {dimension_numbers = #tpu.dot_dimension_numbers<[1], [0], [0], [1], [0, 0, 1, 1], [], []>} : vector<4x8xf32>, vector<8x286xf32>, vector<4x286xf32> -> vector<4x286xf32>
    %267 = arith.addf %262, %266 : vector<4x286xf32>
    %c0_295 = arith.constant 0 : index
    %c0_296 = arith.constant 0 : index
    %268 = vector.load %arg12[%c0_295, %c0_296] : memref<4x1xf32, #tpu.memory_space<vmem>>, vector<4x1xf32>
    %269 = vector.broadcast %268 : vector<4x1xf32> to vector<4x286xf32>
    %270 = arith.addf %267, %269 : vector<4x286xf32>
    %c0_297 = arith.constant 0 : index
    %c0_298 = arith.constant 0 : index
    %c0_299 = arith.constant 0 : index
    %271 = vector.load %arg14[%c0_297, %c0_298, %c0_299] : memref<1x4x286xf32, #tpu.memory_space<vmem>>, vector<1x4x286xf32>
    %272 = vector.shape_cast %271 : vector<1x4x286xf32> to vector<4x286xf32>
    %273 = vector.shape_cast %270 : vector<4x286xf32> to vector<1x4x286xf32>
    tpu.vector_store %arg14[%c0_297, %c0_298, %c0_299], %273 {strides = array<i32>} : memref<1x4x286xf32, #tpu.memory_space<vmem>>, vector<1x4x286xf32>,
    return
  }
  func.func @transform_0(%arg0: i32) -> (i32, i32, i32) {
    %c0_i32 = arith.constant 0 : i32
    %c0_i32_0 = arith.constant 0 : i32
    %c0_i32_1 = arith.constant 0 : i32
    return %arg0, %c0_i32, %c0_i32_0 : i32, i32, i32
  }
  func.func @transform_1(%arg0: i32) -> (i32, i32) {
    %c0_i32 = arith.constant 0 : i32
    %c0_i32_0 = arith.constant 0 : i32
    %c0_i32_1 = arith.constant 0 : i32
    return %c0_i32, %c0_i32_0 : i32, i32
  }
  func.func @transform_2(%arg0: i32) -> (i32, i32, i32) {
    %c0_i32 = arith.constant 0 : i32
    %c0_i32_0 = arith.constant 0 : i32
    %c0_i32_1 = arith.constant 0 : i32
    %c0_i32_2 = arith.constant 0 : i32
    return %c0_i32, %c0_i32_0, %c0_i32_1 : i32, i32, i32
  }
  func.func @transform_3(%arg0: i32) -> (i32, i32) {
    %c0_i32 = arith.constant 0 : i32
    %c0_i32_0 = arith.constant 0 : i32
    %c0_i32_1 = arith.constant 0 : i32
    return %c0_i32, %c0_i32_0 : i32, i32
  }
  func.func @transform_4(%arg0: i32) -> (i32, i32, i32) {
    %c0_i32 = arith.constant 0 : i32
    %c0_i32_0 = arith.constant 0 : i32
    %c0_i32_1 = arith.constant 0 : i32
    %c0_i32_2 = arith.constant 0 : i32
    return %c0_i32, %c0_i32_0, %c0_i32_1 : i32, i32, i32
  }
  func.func @transform_5(%arg0: i32) -> (i32, i32) {
    %c0_i32 = arith.constant 0 : i32
    %c0_i32_0 = arith.constant 0 : i32
    %c0_i32_1 = arith.constant 0 : i32
    return %c0_i32, %c0_i32_0 : i32, i32
  }
  func.func @transform_6(%arg0: i32) -> (i32, i32, i32) {
    %c0_i32 = arith.constant 0 : i32
    %c0_i32_0 = arith.constant 0 : i32
    %c0_i32_1 = arith.constant 0 : i32
    %c0_i32_2 = arith.constant 0 : i32
    return %c0_i32, %c0_i32_0, %c0_i32_1 : i32, i32, i32
  }
  func.func @transform_7(%arg0: i32) -> (i32, i32) {
    %c0_i32 = arith.constant 0 : i32
    %c0_i32_0 = arith.constant 0 : i32
    %c0_i32_1 = arith.constant 0 : i32
    return %c0_i32, %c0_i32_0 : i32, i32
  }
  func.func @transform_8(%arg0: i32) -> (i32, i32, i32) {
    %c0_i32 = arith.constant 0 : i32
    %c0_i32_0 = arith.constant 0 : i32
    %c0_i32_1 = arith.constant 0 : i32
    %c0_i32_2 = arith.constant 0 : i32
    return %c0_i32, %c0_i32_0, %c0_i32_1 : i32, i32, i32
  }
  func.func @transform_9(%arg0: i32) -> (i32, i32) {
    %c0_i32 = arith.constant 0 : i32
    %c0_i32_0 = arith.constant 0 : i32
    %c0_i32_1 = arith.constant 0 : i32
    return %c0_i32, %c0_i32_0 : i32, i32
  }
  func.func @transform_10(%arg0: i32) -> (i32, i32, i32) {
    %c0_i32 = arith.constant 0 : i32
    %c0_i32_0 = arith.constant 0 : i32
    %c0_i32_1 = arith.constant 0 : i32
    %c0_i32_2 = arith.constant 0 : i32
    return %c0_i32, %c0_i32_0, %c0_i32_1 : i32, i32, i32
  }
  func.func @transform_11(%arg0: i32) -> (i32, i32) {
    %c0_i32 = arith.constant 0 : i32
    %c0_i32_0 = arith.constant 0 : i32
    %c0_i32_1 = arith.constant 0 : i32
    return %c0_i32, %c0_i32_0 : i32, i32
  }
  func.func @transform_12(%arg0: i32) -> (i32, i32, i32) {
    %c0_i32 = arith.constant 0 : i32
    %c0_i32_0 = arith.constant 0 : i32
    %c0_i32_1 = arith.constant 0 : i32
    return %arg0, %c0_i32, %c0_i32_0 : i32, i32, i32
  }
  func.func @transform_13(%arg0: i32) -> (i32, i32, i32) {
    %c0_i32 = arith.constant 0 : i32
    %c0_i32_0 = arith.constant 0 : i32
    %c0_i32_1 = arith.constant 0 : i32
    return %arg0, %c0_i32, %c0_i32_0 : i32, i32, i32
  }
}

</mosaic_0001>

<bundles_post_ra>
// kernel: tpu_custom_call.1
= control target key start
LH: loop header
LB: loop body
LE: loop exit
PB: predicated region body
PF: predicated region fallthrough
CT: control target
= control target key end

     0   :  { %s10036_s0 = inlined_call_operand.vmem [shape: f32[2,4,324], index: 0, kind: input, shape index: {}]   ;;  %s10037_s1 = inlined_call_operand.vmem [shape: f32[1,286], index: 1, kind: input, shape index: {}]   ;;  %s10038_s2 = inlined_call_operand.vmem [shape: f32[9,16,4], index: 2, kind: input, shape index: {}]   ;;  %s10039_s3 = inlined_call_operand.vmem [shape: f32[16,1], index: 3, kind: input, shape index: {}]   ;;  %s10040_s4 = inlined_call_operand.vmem [shape: f32[9,8,8], index: 4, kind: input, shape index: {}]   ;;  %s10041_s5 = inlined_call_operand.vmem [shape: f32[8,1], index: 5, kind: input, shape index: {}]   ;;  %s10042_s6 = inlined_call_operand.vmem [shape: f32[9,8,8], index: 6, kind: input, shape index: {}]   ;;  %s10043_s7 = inlined_call_operand.vmem [shape: f32[8,1], index: 7, kind: input, shape index: {}]   ;;  %s10044_s8 = inlined_call_operand.vmem [shape: f32[9,4,8], index: 8, kind: input, shape index: {}]   ;;  %s10045_s9 = inlined_call_operand.vmem [shape: f32[4,1], index: 9, kind: input, shape index: {}]   ;;  %s10046_s10 = inlined_call_operand.vmem [shape: f32[9,4,8], index: 10, kind: input, shape index: {}]   ;;  %s10047_s11 = inlined_call_operand.vmem [shape: f32[4,1], index: 11, kind: input, shape index: {}]   ;;  %s10048_s12 = inlined_call_operand.hbm [shape: f32[2,4,286], index: 12, kind: output, shape index: {0}]   ;;  %s10049_s13 = inlined_call_operand.hbm [shape: f32[2,4,286], index: 13, kind: output, shape index: {1}]  }
   0x1   :  { %10070 = sst [smem:[#allocation10_spill]] %s10036_s0 }
   0x2   :  { %10071 = sst [smem:[#allocation11_spill]] %s10037_s1 }
   0x3   :  { %10072 = sst [smem:[#allocation12_spill]] %s10038_s2 }
   0x4   :  { %10073 = sst [smem:[#allocation13_spill]] %s10039_s3 }
   0x5   :  { %19 = vsyncpa [#allocation5], 0 }
   0x6   :  { %21 = vsyncpa [#allocation5 + $0x1], 0 }
   0x7   :  { %22 = vsyncpa [#allocation7], 0 }
   0x8   :  { %24 = vsyncpa [#allocation7 + $0x1], 0  ;;  %s9001_s25 = smov 0   ;;  %s9003_s26 = smov 0  }
   0x9   :  { %s9005_s27 = smov 0   ;;  %s9007_s28 = smov 0  }
   0xa LB: > { %s9022_s29 = sadd.s32 4294967295, %s8915_s28   ;;  %s8130_s30 = sadd.s32 4294967294, %s8915_s28   ;;  %s8915_s28 = sphi %s9007_s28, %s10094_s28   ;;  %s8911_s27 = sphi %s9005_s27, %s10093_s27   ;;  %s8907_s26 = sphi %s9003_s26, %s10092_s26   ;;  %s8903_s25 = sphi %s9001_s25, %s10091_s25  }
   0xb   : > { %s9026_s14 = sadd.s32 1, %s8915_s28   ;;  %s294_s15 = sadd.s32 1, %s8911_s27 }
   0xc   : > { %s291_s16 = ssub.s32 %s8915_s28, %s9026_s14  ;;  %p304_p0 = scmp.ne.s32.totalorder %s8911_s27, %s8907_s26 }
   0xd   : > { %p292_p1 = scmp.eq.s32.totalorder %s291_s16, 0  ;;  %p305_p2 = scmp.eq.s32.totalorder %s9022_s29, 1 }
   0xe   : > { %p310_p3 = scmp.ne.s32.totalorder %s8907_s26, %s8903_s25  ;;  %p311_p4 = scmp.eq.s32.totalorder %s8130_s30, 1 }
   0xf   : > { %s9037_s17 = scalar_select %p292_p1, %s8911_s27, %s294_s15  }
  0x10   : > { %p9039_p5 = por %p305_p2, %p304_p0  ;;  %p9043_p6 = por %p311_p4, %p310_p3 }
  0x11   : > { %p8133_p7 = scmp.ge.s32.totalorder %s8915_s28, 1  ;;  %p396_p8 = scmp.lt.s32.totalorder %s8915_s28, 3 }
  0x13   : > { %p397_p9 = pnand %p8133_p7, %p396_p8 }
  0x14   : > { %p445_p10 = scmp.lt.s32.totalorder (!%p397_p9), %s9022_s29, 1  ;;  %s10076_s2 = sld [smem:[#allocation12_spill]] (!%p397_p9)  ;;  %vm476_vm0 = vcmask (!%p397_p9), 31744   ;;  %v8917_v1 = vmov (!%p397_p9), 0.0   ;;  %v8926_v14 = vmov (!%p397_p9), 0   ;;  %vm483_vm1 = vcmask (!%p397_p9), 1043456  }
  0x15   : > { %400 = sbr.rel (%p397_p9) target bundleno = 1631 (0x65f), region = 68  ;;  %554 = vmatprep.mubr.f32.mxu0 (!%p397_p9), %v8917_v1  ;;  %s10077_s0 = sld [smem:[#allocation10_spill]] (!%p397_p9)  ;;  %8819 = vset.pattern.permute.xlu1 (!%p397_p9), %v8926_v14  ;;  %vm473_vm2 = vcmask (!%p397_p9), 1039360   ;;  %vm820_vm3 = vcmask (!%p397_p9), 1031168   ;;  %vm1007_vm4 = vcmask (!%p397_p9), 900096   ;;  %vm1194_vm5 = vcmask (!%p397_p9), 891904  }
  0x16   : > { %s10066_s16 = smov (!%p397_p9), 127   ;;  %s10058_s20 = smov (!%p397_p9), 126   ;;  %8818 = vset.pattern.permute.xlu0 (!%p397_p9), %v8926_v14  ;;  %vm1381_vm6 = vcmask (!%p397_p9), 883712   ;;  %vm1568_vm7 = vcmask (!%p397_p9), 752640   ;;  %vm1755_vm8 = vcmask (!%p397_p9), 744448   ;;  %vm1942_vm9 = vcmask (!%p397_p9), 736256  }
  0x17   : > { %s10056_s21 = smov (!%p397_p9), 110   ;;  %s10052_s24 = smov (!%p397_p9), 92   ;;  %vm451_vm10 = vcmask (!%p397_p9), 154624   ;;  %vm453_vm11 = vcmask (!%p397_p9), 556424   ;;  %vm2175_vm12 = vcmask (!%p397_p9), 1047704   ;;  %vm2178_vm13 = vcmask (!%p397_p9), 400384  }
  0x18   : > { %s10064_s30 = smov (!%p397_p9), 91   ;;  %s10078_s3 = sld [smem:[#allocation13_spill]] (!%p397_p9)  ;;  %452 = vst.msk [vmem:[#allocation2] sm:$0xff] (!%p397_p9), %vm451_vm10, %v8917_v1  ;;  %455 = vst.msk [vmem:[#allocation3] sm:$0xff] (!%p397_p9), %vm451_vm10, %v8917_v1  ;;  %vm8928_vm14 = vmmov (!%p397_p9), 0   ;;  %vm2217_vm15 = vcmask (!%p397_p9), 64512  }
  0x19   : > { %454 = vst.msk [vmem:[#allocation2 + $0x10] sm:$0xff] (!%p397_p9), %vm453_vm11, %v8917_v1  ;;  %456 = vst.msk [vmem:[#allocation3 + $0x10] sm:$0xff] (!%p397_p9), %vm453_vm11, %v8917_v1  ;;  %s10079_s1 = sld [smem:[#allocation11_spill]] (!%p397_p9) }
  0x1a   : > { %v9053_v0 = vld [vmem:[%s10076_s2 + $0x10] sm:$0xff] (!%p397_p9)  ;;  %v8136_v19 = vld [vmem:[%s10076_s2 + $0x18] sm:$0xff] (!%p397_p9)  ;;  %v457_v22 = vld [vmem:[%s10076_s2] sm:$0xff] (!%p397_p9) }
  0x1b   : > { %8423 = vmatprep.mubr.msk.f32.mxu1 (!%p397_p9), %vm476_vm0, %v9053_v0  ;;  %v458_v26 = vld [vmem:[%s10076_s2 + $0x8] sm:$0xff] (!%p397_p9)  ;;  %v8151_v30 = vld [vmem:[%s10076_s2 + $0x20] sm:$0xff] (!%p397_p9)  ;;  %v8160_v37 = vld [vmem:[%s10076_s2 + $0x30] sm:$0xff] (!%p397_p9) }
  0x1c   : > { %s446_s22 = scalar_select %p445_p10, %s9022_s29, 1  ;;  %v8152_v34 = vld [vmem:[%s10076_s2 + $0x28] sm:$0xff]  ;;  %v8161_v41 = vld [vmem:[%s10076_s2 + $0x38] sm:$0xff]  ;;  %v8169_v44 = vld [vmem:[%s10076_s2 + $0x40] sm:$0xff] }
  0x1d   : > { %v8170_v48 = vld [vmem:[%s10076_s2 + $0x48] sm:$0xff]  ;;  %v8178_v51 = vld [vmem:[%s10076_s2 + $0x50] sm:$0xff]  ;;  %v8179_v55 = vld [vmem:[%s10076_s2 + $0x58] sm:$0xff] }
  0x1e   : > { %s8759_s23 = smul.u32 12, %s446_s22  ;;  %s10050_s22 = smov 109   ;;  %v2116_v12 = vld [vmem:[%s10078_s3 + $0x8] sm:$0xff]  ;;  %v2115_v13 = vld [vmem:[%s10078_s3] sm:$0xff] }
  0x1f   : > { %v8187_v58 = vld [vmem:[%s10076_s2 + $0x60] sm:$0xff]  ;;  %v8188_v61 = vld [vmem:[%s10076_s2 + $0x68] sm:$0xff] }
  0x20   : > { %s9062_s15 = scalar_lea.vmem %s10077_s0, %s8759_s23  ;;  %s10054_s23 = smov 108  }
  0x21   : > { %v9065_v2 = vld [vmem:[%s9062_s15] sm:$0xff]  ;;  %v9076_v4 = vld [vmem:[%s9062_s15 + $0x8] sm:$0xf] }
  0x22   : > { %467 = vrot.lane.b32.xlu1 %v9065_v2, %s10066_s16  ;;  %v9071_v3 = vcombine.high %v9065_v2, %v9065_v2  ;;  %v810_v5 = vld [vmem:[%s9062_s15 + $0x8] sm:$0xf] }
  0x23   : > { %v997_v6 = vld [vmem:[%s9062_s15 + $0x8] sm:$0xf] }
  0x24   : > { %469 = vrot.lane.b32.xlu0 %v9071_v3, %s10066_s16  ;;  %v1184_v7 = vld [vmem:[%s9062_s15 + $0x8] sm:$0xf] }
  0x25   : > { %v1371_v8 = vld [vmem:[%s9062_s15 + $0x8] sm:$0xf] }
  0x26   : > { %816 = vrot.lane.b32.xlu1 %v9071_v3, %s10058_s20  ;;  %v1558_v9 = vld [vmem:[%s9062_s15 + $0x8] sm:$0xf] }
  0x27   : > { %v1745_v10 = vld [vmem:[%s9062_s15 + $0x8] sm:$0xf] }
  0x28   : > { %471 = vrot.lane.b32.xlu0 %v9076_v4, %s10066_s16  ;;  %v1932_v11 = vld [vmem:[%s9062_s15 + $0x8] sm:$0xf]  ;;  %s10080_s15 = smov 126  }
  0x2a   : > { %814 = vrot.lane.b32.xlu1 %v9065_v2, %s10058_s20 }
  0x2c   : > { %818 = vrot.lane.b32.xlu0 %v810_v5, %s10058_s20  ;;  %v8197_v5 = vld [vmem:[%s10076_s2 + $0x78] sm:$0xff]  ;;  %s10081_s20 = smov 110  }
  0x2e   : > { %1005 = vrot.lane.b32.xlu1 %v997_v6, %s10056_s21 }
  0x30   : > { %1003 = vrot.lane.b32.xlu0 %v9071_v3, %s10056_s21 }
  0x32   : > { %1190 = vrot.lane.b32.xlu1 %v9071_v3, %s10050_s22 }
  0x34   : > { %1001 = vrot.lane.b32.xlu0 %v9065_v2, %s10056_s21  ;;  %s10082_s21 = smov 109  }
  0x36   : > { %1188 = vrot.lane.b32.xlu1 %v9065_v2, %s10050_s22 }
  0x38   : > { %1192 = vrot.lane.b32.xlu0 %v1184_v7, %s10050_s22  ;;  %s10060_s22 = smov 90   ;;  %v8205_v7 = vld [vmem:[%s10076_s2 + $0x80] sm:$0xff] }
  0x3a   : > { %1379 = vrot.lane.b32.xlu1 %v1371_v8, %s10054_s23  ;;  %v8206_v8 = vld [vmem:[%s10076_s2 + $0x88] sm:$0xff] }
  0x3c   : > { %1377 = vrot.lane.b32.xlu0 %v9071_v3, %s10054_s23 }
  0x3e   : > { %1564 = vrot.lane.b32.xlu1 %v9071_v3, %s10052_s24 }
  0x40   : > { %1375 = vrot.lane.b32.xlu0 %v9065_v2, %s10054_s23  ;;  %s10084_s23 = smov 92  }
  0x42   : > { %1562 = vrot.lane.b32.xlu1 %v9065_v2, %s10052_s24 }
  0x44   : > { %1566 = vrot.lane.b32.xlu0 %v1558_v9, %s10052_s24  ;;  %v2140_v9 = vlaneseq  ;;  %s10062_s24 = smov 19  }
  0x46   : > { %1753 = vrot.lane.b32.xlu1 %v1745_v10, %s10064_s30  ;;  %v2141_v10 = vshrl.u32 %v2140_v9, 7 }
  0x48   : > { %1751 = vrot.lane.b32.xlu0 %v9071_v3, %s10064_s30  ;;  %v2146_v14 = vsub.s32 1, %v2141_v10 }
  0x4a   : > { %1938 = vrot.lane.b32.xlu1 %v9071_v3, %s10060_s22 }
  0x4c   : > { %1749 = vrot.lane.b32.xlu0 %v9065_v2, %s10064_s30 }
  0x4e   : > { %1936 = vrot.lane.b32.xlu1 %v9065_v2, %s10060_s22 }
  0x50   : > { %1940 = vrot.lane.b32.xlu0 %v1932_v11, %s10060_s22  ;;  %v2142_v11 = vsub.s32 0, %v2141_v10  ;;  %s10083_s22 = smov 108  }
  0x52   : > { %2124 = vperm.xlu1 %8819, %v2116_v12   ;;  %v450_v12 = vld [vmem:[%s10079_s1] sm:$0x7]  ;;  %s10086_s1 = smov 91  }
  0x54   : > { %2119 = vperm.xlu0 %8818, %v2115_v13  }
  0x94   : > { %v468_v15 = vpop.permute.xlu1 %467 }
  0x96   : > { %v470_v16 = vpop.permute.xlu0 %469 }
  0x97   : > { %v474_v21 = vsel %vm473_vm2, %v468_v15, %v470_v16 }
  0x98   : > { %v817_v17 = vpop.permute.xlu1 %816 }
  0x9a   : > { %v472_v18 = vpop.permute.xlu0 %471 }
  0x9b   : > { %8421 = vmatprep.subr.msk.mxu1 %vm483_vm1, %v472_v18  ;;  %v475_v20 = vsel %vm473_vm2, %v470_v16, %v472_v18 }
  0x9c   : > { %8137 = vmatprep.subr.msk.mxu0 %vm483_vm1, %v475_v20  ;;  %8422 = vmatpush3.msk.msra.mxu1 %vm483_vm1, %v472_v18  ;;  %v815_v23 = vpop.permute.xlu1 %814  ;;  %v2150_v18 = vsub.s32 2, %v2141_v10 }
  0x9d   : > { %8138 = vmatpush1.msk.msra.mxu0 %vm483_vm1, %v474_v21  ;;  %8424 = vmatmul.mubr.msk.f32.vlgmr.msra.gmra.mrb[0].mxu1 %vm476_vm0, %v8136_v19  ;;  %v821_v29 = vsel %vm820_vm3, %v815_v23, %v817_v17 }
  0x9e   : > { %8139 = vmatmul.mubr.msk.f32.vlgmr.msra.gmra.mrb[0].mxu0 %vm476_vm0, %v9053_v0  ;;  %8144 = vmatprep.subr.msk.mxu0 %vm483_vm1, %v9071_v3  ;;  %v819_v24 = vpop.permute.xlu0 %818 }
  0x9f   : > { %560 = vmatprep.mubr.f32.mxu0 %v8917_v1  ;;  %8145 = vmatpush1.msk.msra.mxu0 %vm483_vm1, %v9065_v2  ;;  %v822_v25 = vsel %vm820_vm3, %v817_v17, %v819_v24  ;;  %v8196_v2 = vld [vmem:[%s10076_s2 + $0x70] sm:$0xff]  ;;  %s10087_s2 = smov 19  }
  0xa0   : > { %8426 = vmatprep.subr.msk.mxu1 %vm483_vm1, %v9076_v4  ;;  %8428 = vmatprep.mubr.msk.f32.mxu1 %vm476_vm0, %v457_v22  ;;  %v1006_v28 = vpop.permute.xlu1 %1005 }
  0xa1   : > { %8427 = vmatpush3.msk.msra.mxu1 %vm483_vm1, %v9076_v4  ;;  %8153 = vmatprep.subr.msk.mxu0 %vm483_vm1, %v822_v25 }
  0xa2   : > { %8140 = vmatmul.mubr.msk.f32.gmra.mrb[2].mxu0 %vm476_vm0, %v8136_v19  ;;  %8431 = vmatprep.subr.msk.mxu1 %vm483_vm1, %v819_v24  ;;  %v1004_v27 = vpop.permute.xlu0 %1003 }
  0xa3   : > { %718 = vmatprep.mubr.f32.mxu0 %v8917_v1  ;;  %v1009_v31 = vsel %vm1007_vm4, %v1004_v27, %v1006_v28 }
  0xa4   : > { %v1191_v33 = vpop.permute.xlu1 %1190 }
  0xa5   : > { %8429 = vmatmul.mubr.msk.f32.vlgmr.msra.gmra.mrb[0].mxu1 %vm476_vm0, %v458_v26 }
  0xa6   : > { %8146 = vmatmul.mubr.msk.f32.vlgmr.msra.gmra.mrb[0].mxu0 %vm476_vm0, %v457_v22  ;;  %8432 = vmatpush3.msk.msra.mxu1 %vm483_vm1, %v819_v24  ;;  %v1002_v32 = vpop.permute.xlu0 %1001  ;;  %v9299_v22 = vrot.slane %v450_v12, %v2142_v11  ;;  %v9301_v24 = vrot.slane %v450_v12, %v2146_v14 }
  0xa7   : > { %8154 = vmatpush1.msk.msra.mxu0 %vm483_vm1, %v821_v29  ;;  %724 = vmatprep.mubr.f32.mxu0 %v8917_v1  ;;  %v1008_v36 = vsel %vm1007_vm4, %v1002_v32, %v1004_v27  ;;  %v9303_v29 = vrot.slane %v450_v12, %v2150_v18 }
  0xa8   : > { %8433 = vmatprep.mubr.msk.f32.mxu1 %vm476_vm0, %v8151_v30  ;;  %8162 = vmatprep.subr.msk.mxu0 %vm483_vm1, %v1009_v31  ;;  %v1189_v39 = vpop.permute.xlu1 %1188 }
  0xa9   : > { %8436 = vmatprep.subr.msk.mxu1 %vm483_vm1, %v1006_v28  ;;  %v1195_v43 = vsel %vm1194_vm5, %v1189_v39, %v1191_v33 }
  0xaa   : > { %8147 = vmatmul.mubr.msk.f32.gmra.mrb[2].mxu0 %vm476_vm0, %v458_v26  ;;  %v1193_v35 = vpop.permute.xlu0 %1192 }
  0xab   : > { %899 = vmatprep.mubr.f32.mxu0 %v8917_v1  ;;  %v1196_v38 = vsel %vm1194_vm5, %v1191_v33, %v1193_v35 }
  0xac   : > { %v1380_v42 = vpop.permute.xlu1 %1379 }
  0xad   : > { %8434 = vmatmul.mubr.msk.f32.vlgmr.msra.gmra.mrb[0].mxu1 %vm476_vm0, %v8152_v34 }
  0xae   : > { %8155 = vmatmul.mubr.msk.f32.vlgmr.msra.gmra.mrb[0].mxu0 %vm476_vm0, %v8151_v30  ;;  %8437 = vmatpush3.msk.msra.mxu1 %vm483_vm1, %v1006_v28  ;;  %v1378_v40 = vpop.permute.xlu0 %1377 }
  0xaf   : > { %8163 = vmatpush1.msk.msra.mxu0 %vm483_vm1, %v1008_v36  ;;  %905 = vmatprep.mubr.f32.mxu0 %v8917_v1  ;;  %v1383_v45 = vsel %vm1381_vm6, %v1378_v40, %v1380_v42 }
  0xb0   : > { %8438 = vmatprep.mubr.msk.f32.mxu1 %vm476_vm0, %v8160_v37  ;;  %8171 = vmatprep.subr.msk.mxu0 %vm483_vm1, %v1196_v38  ;;  %v1565_v47 = vpop.permute.xlu1 %1564 }
  0xb1   : > { %8441 = vmatprep.subr.msk.mxu1 %vm483_vm1, %v1193_v35 }
  0xb2   : > { %8156 = vmatmul.mubr.msk.f32.gmra.mrb[2].mxu0 %vm476_vm0, %v8152_v34  ;;  %v1376_v46 = vpop.permute.xlu0 %1375 }
  0xb3   : > { %1086 = vmatprep.mubr.f32.mxu0 %v8917_v1  ;;  %v1382_v50 = vsel %vm1381_vm6, %v1376_v46, %v1378_v40 }
  0xb4   : > { %v1563_v53 = vpop.permute.xlu1 %1562 }
  0xb5   : > { %8439 = vmatmul.mubr.msk.f32.vlgmr.msra.gmra.mrb[0].mxu1 %vm476_vm0, %v8161_v41  ;;  %v1569_v57 = vsel %vm1568_vm7, %v1563_v53, %v1565_v47 }
  0xb6   : > { %8164 = vmatmul.mubr.msk.f32.vlgmr.msra.gmra.mrb[0].mxu0 %vm476_vm0, %v8160_v37  ;;  %8442 = vmatpush3.msk.msra.mxu1 %vm483_vm1, %v1193_v35  ;;  %v1567_v49 = vpop.permute.xlu0 %1566 }
  0xb7   : > { %8172 = vmatpush1.msk.msra.mxu0 %vm483_vm1, %v1195_v43  ;;  %1092 = vmatprep.mubr.f32.mxu0 %v8917_v1  ;;  %v1570_v52 = vsel %vm1568_vm7, %v1565_v47, %v1567_v49 }
  0xb8   : > { %8443 = vmatprep.mubr.msk.f32.mxu1 %vm476_vm0, %v8169_v44  ;;  %8180 = vmatprep.subr.msk.mxu0 %vm483_vm1, %v1383_v45  ;;  %v1754_v56 = vpop.permute.xlu1 %1753 }
  0xb9   : > { %8446 = vmatprep.subr.msk.mxu1 %vm483_vm1, %v1380_v42 }
  0xba   : > { %8165 = vmatmul.mubr.msk.f32.gmra.mrb[2].mxu0 %vm476_vm0, %v8161_v41  ;;  %v1752_v54 = vpop.permute.xlu0 %1751 }
  0xbb   : > { %1273 = vmatprep.mubr.f32.mxu0 %v8917_v1  ;;  %v1757_v59 = vsel %vm1755_vm8, %v1752_v54, %v1754_v56 }
  0xbc   : > { %v1939_v63 = vpop.permute.xlu1 %1938 }
  0xbd   : > { %8444 = vmatmul.mubr.msk.f32.vlgmr.msra.gmra.mrb[0].mxu1 %vm476_vm0, %v8170_v48 }
  0xbe   : > { %8173 = vmatmul.mubr.msk.f32.vlgmr.msra.gmra.mrb[0].mxu0 %vm476_vm0, %v8169_v44  ;;  %8447 = vmatpush3.msk.msra.mxu1 %vm483_vm1, %v1380_v42  ;;  %v1750_v60 = vpop.permute.xlu0 %1749 }
  0xbf   : > { %8181 = vmatpush1.msk.msra.mxu0 %vm483_vm1, %v1382_v50  ;;  %1279 = vmatprep.mubr.f32.mxu0 %v8917_v1  ;;  %v1756_v0 = vsel %vm1755_vm8, %v1750_v60, %v1752_v54 }
  0xc0   : > { %8448 = vmatprep.mubr.msk.f32.mxu1 %vm476_vm0, %v8178_v51  ;;  %8189 = vmatprep.subr.msk.mxu0 %vm483_vm1, %v1570_v52  ;;  %v1937_v4 = vpop.permute.xlu1 %1936 }
  0xc1   : > { %8451 = vmatprep.subr.msk.mxu1 %vm483_vm1, %v1567_v49  ;;  %v1943_v6 = vsel %vm1942_vm9, %v1937_v4, %v1939_v63 }
  0xc2   : > { %8174 = vmatmul.mubr.msk.f32.gmra.mrb[2].mxu0 %vm476_vm0, %v8170_v48  ;;  %v1941_v62 = vpop.permute.xlu0 %1940 }
  0xc3   : > { %1460 = vmatprep.mubr.f32.mxu0 %v8917_v1  ;;  %v1944_v3 = vsel %vm1942_vm9, %v1939_v63, %v1941_v62 }
  0xc5   : > { %8449 = vmatmul.mubr.msk.f32.vlgmr.msra.gmra.mrb[0].mxu1 %vm476_vm0, %v8179_v55 }
  0xc6   : > { %8182 = vmatmul.mubr.msk.f32.vlgmr.msra.gmra.mrb[0].mxu0 %vm476_vm0, %v8178_v51  ;;  %8452 = vmatpush3.msk.msra.mxu1 %vm483_vm1, %v1567_v49 }
  0xc7   : > { %8190 = vmatpush1.msk.msra.mxu0 %vm483_vm1, %v1569_v57  ;;  %1466 = vmatprep.mubr.f32.mxu0 %v8917_v1 }
  0xc8   : > { %8453 = vmatprep.mubr.msk.f32.mxu1 %vm476_vm0, %v8187_v58  ;;  %8198 = vmatprep.subr.msk.mxu0 %vm483_vm1, %v1757_v59 }
  0xc9   : > { %8456 = vmatprep.subr.msk.mxu1 %vm483_vm1, %v1754_v56 }
  0xca   : > { %8183 = vmatmul.mubr.msk.f32.gmra.mrb[2].mxu0 %vm476_vm0, %v8179_v55 }
  0xcb   : > { %1647 = vmatprep.mubr.f32.mxu0 %v8917_v1 }
  0xcd   : > { %8454 = vmatmul.mubr.msk.f32.vlgmr.msra.gmra.mrb[0].mxu1 %vm476_vm0, %v8188_v61 }
  0xce   : > { %8191 = vmatmul.mubr.msk.f32.vlgmr.msra.gmra.mrb[0].mxu0 %vm476_vm0, %v8187_v58  ;;  %8457 = vmatpush3.msk.msra.mxu1 %vm483_vm1, %v1754_v56 }
  0xcf   : > { %8199 = vmatpush1.msk.msra.mxu0 %vm483_vm1, %v1756_v0  ;;  %1653 = vmatprep.mubr.f32.mxu0 %v8917_v1  ;;  %v8214_v0 = vld [vmem:[%s10040_s4 + $0x8] sm:$0xff] }
  0xd0   : > { %8458 = vmatprep.mubr.msk.f32.mxu1 %vm476_vm0, %v8196_v2  ;;  %8207 = vmatprep.subr.msk.mxu0 %vm483_vm1, %v1944_v3 }
  0xd1   : > { %8461 = vmatprep.subr.msk.mxu1 %vm483_vm1, %v1941_v62  ;;  %v2125_v26 = vpop.permute.xlu1 %2124 }
  0xd2   : > { %8192 = vmatmul.mubr.msk.f32.gmra.mrb[2].mxu0 %vm476_vm0, %v8188_v61 }
  0xd3   : > { %1834 = vmatprep.mubr.f32.mxu0 %v8917_v1  ;;  %v2120_v13 = vpop.permute.xlu0 %2119 }
  0xd5   : > { %8459 = vmatmul.mubr.msk.f32.vlgmr.msra.gmra.mrb[0].mxu1 %vm476_vm0, %v8197_v5 }
  0xd6   : > { %8200 = vmatmul.mubr.msk.f32.vlgmr.msra.gmra.mrb[0].mxu0 %vm476_vm0, %v8196_v2  ;;  %8462 = vmatpush3.msk.msra.mxu1 %vm483_vm1, %v1941_v62 }
  0xd7   : > { %8208 = vmatpush1.msk.msra.mxu0 %vm483_vm1, %v1943_v6  ;;  %1840 = vmatprep.mubr.f32.mxu0 %v8917_v1 }
  0xd8   : > { %8463 = vmatprep.mubr.msk.f32.mxu1 %vm476_vm0, %v8205_v7  ;;  %8486 = vmatprep.subr.mxu0 %v8917_v1 }
  0xda   : > { %8201 = vmatmul.mubr.msk.f32.gmra.mrb[2].mxu0 %vm476_vm0, %v8197_v5 }
  0xdb   : > { %2021 = vmatprep.mubr.f32.mxu0 %v8917_v1 }
  0xdd   : > { %8464 = vmatmul.mubr.msk.f32.vlgmr.msra.gmra.mrb[0].mxu1 %vm476_vm0, %v8206_v8 }
  0xde   : > { %8209 = vmatmul.mubr.msk.f32.vlgmr.msra.gmra.mrb[0].mxu0 %vm476_vm0, %v8205_v7  ;;  %2285 = vmatprep.mubr.f32.mxu1 %v8917_v1  ;;  %v2197_v7 = vld [vmem:[%s10040_s4] sm:$0xff] }
  0xdf   : > { %2027 = vmatprep.mubr.f32.mxu0 %v8917_v1 }
  0xe2   : > { %8210 = vmatmul.mubr.msk.f32.gmra.mrb[2].mxu0 %vm476_vm0, %v8206_v8  ;;  %vm6560_vm0 = vcmask 240640  }
  0xe3   : > { %8488 = vmatprep.mubr.msk.f32.mxu0 %vm8928_vm14, %v8917_v1 }
 0x1b0   : > { %v8465_v15 = vpop.f32.mrb[0].mxu1 }
 0x1b1   : > { %v2023_v16 = vpop.f32.mrb[0].mxu0  ;;  %v2100_v17 = vpop.f32.mrb[1].mxu1  ;;  %v2132_v41 = vadd.f32 %v8465_v15, %v2125_v26  ;;  %v8219_v15 = vld [vmem:[%s10040_s4 + $0x10] sm:$0xff] }
 0x1b2   : > { %v2127_v19 = vadd.f32 %v2120_v13, %v2023_v16  ;;  %v2129_v20 = vadd.f32 %v2120_v13, %v2100_v17  ;;  %v2025_v21 = vpop.f32.mrb[1].mxu0 }
 0x1b3   : > { %v2128_v23 = vadd.f32 %v2120_v13, %v2025_v21  ;;  %v2138_v43 = vmax.f32 %v2132_v41, 0.0  ;;  %v8225_v13 = vld [vmem:[%s10040_s4 + $0x20] sm:$0xff] }
 0x1b4   : > { %v2133_v25 = vmax.f32 %v2127_v19, 0.0  ;;  %v2135_v33 = vmax.f32 %v2129_v20, 0.0  ;;  %v8228_v20 = vld [vmem:[%s10040_s4 + $0x28] sm:$0xff] }
 0x1b5   : > { %v2134_v27 = vmax.f32 %v2128_v23, 0.0  ;;  %v2029_v28 = vpop.f32.mrb[2].mxu0  ;;  %v2160_v47 = vmul.f32 %v9303_v29, %v2138_v43  ;;  %v8222_v23 = vld [vmem:[%s10040_s4 + $0x18] sm:$0xff] }
 0x1b6   : > { %v2130_v30 = vadd.f32 %v2125_v26, %v2029_v28  ;;  %v2031_v31 = vpop.f32.mrb[3].mxu0  ;;  %v2155_v32 = vmul.f32 %v9299_v22, %v2133_v25  ;;  %v2157_v39 = vmul.f32 %v9303_v29, %v2135_v33  ;;  %v8231_v28 = vld [vmem:[%s10040_s4 + $0x30] sm:$0xff] }
 0x1b7   : > { %v2156_v34 = vmul.f32 %v9301_v24, %v2134_v27  ;;  %v2131_v35 = vadd.f32 %v2125_v26, %v2031_v31 }
 0x1b8   : > { %v2136_v36 = vmax.f32 %v2130_v30, 0.0  ;;  %2164 = vrot.lane.b32.xlu1 %v2155_v32, %s10062_s24 }
 0x1b9   : > { %2166 = vrot.lane.b32.xlu0 %v2156_v34, %s10062_s24  ;;  %v2137_v38 = vmax.f32 %v2131_v35, 0.0  ;;  %v8234_v34 = vld [vmem:[%s10040_s4 + $0x38] sm:$0xff] }
 0x1ba   : > { %v2158_v37 = vmul.f32 %v9299_v22, %v2136_v36 }
 0x1bb   : > { %v2159_v40 = vmul.f32 %v9301_v24, %v2137_v38  ;;  %v8237_v38 = vld [vmem:[%s10040_s4 + $0x40] sm:$0xff] }
 0x1bc   : > { %2168 = vrot.lane.b32.xlu1 %v2157_v39, %s10062_s24 }
 0x1bd   : > { %2183 = vrot.lane.b32.xlu0 %v2158_v37, %s10062_s24 }
 0x1c0   : > { %2185 = vrot.lane.b32.xlu1 %v2159_v40, %s10062_s24 }
 0x22a   : > { %v2165_v42 = vpop.permute.xlu1 %2164 }
 0x22b   : > { %2176 = vst.msk [vmem:[#allocation2] sm:$0xff] %vm2175_vm12, %v2165_v42  ;;  %v2167_v44 = vpop.permute.xlu0 %2166 }
 0x22c   : > { %v9317_v45 = vsel %vm451_vm10, %v2165_v42, %v2167_v44  ;;  %v3626_v42 = vld [vmem:[%s10041_s5] sm:$0xff] }
 0x22d   : > { %2208 = vrot.lane.b32.xlu0 %v9317_v45, %s10066_s16 }
 0x22e   : > { %v2169_v46 = vpop.permute.xlu1 %2168 }
 0x22f   : > { %v2171_v48 = vsel %vm451_vm10, %v2167_v44, %v2169_v46  ;;  %v2184_v49 = vpop.permute.xlu0 %2183  ;;  %v5086_v46 = vld [vmem:[%s10043_s7] sm:$0xff] }
 0x230   : > { %2179 = vst.msk [vmem:[#allocation2 + $0x10] sm:$0xff] %vm2178_vm13, %v2171_v48 }
 0x231   : > { %2194 = vst.msk [vmem:[#allocation3] sm:$0xff] %vm2175_vm12, %v2184_v49  ;;  %2187 = vrot.lane.b32.xlu0 %v2160_v47, %s10062_s24  ;;  %s10085_s24 = smov 90  }
 0x232   : > { %v2198_v51 = vld [vmem:[#allocation2] sm:$0xff]  ;;  %v2186_v52 = vpop.permute.xlu1 %2185 }
 0x233   : > { %v9369_v53 = vsel %vm451_vm10, %v2184_v49, %v2186_v52 }
 0x235   : > { %2510 = vrot.lane.b32.xlu0 %v9317_v45, %s10080_s15 }
 0x237   : > { %v9330_v50 = vld [vmem:[#allocation2 + $0x10] sm:$0xff] }
 0x238   : > { %2210 = vrot.lane.b32.xlu1 %v9330_v50, %s10066_s16  ;;  %v9373_v54 = vld [vmem:[#allocation3] sm:$0xff] }
 0x239   : > { %2508 = vrot.lane.b32.xlu0 %v2198_v51, %s10080_s15 }
 0x23c   : > { %2206 = vrot.lane.b32.xlu1 %v2198_v51, %s10066_s16 }
 0x23d   : > { %2672 = vrot.lane.b32.xlu0 %v9330_v50, %s10081_s20 }
 0x240   : > { %2512 = vrot.lane.b32.xlu1 %v9330_v50, %s10080_s15 }
 0x241   : > { %2830 = vrot.lane.b32.xlu0 %v9317_v45, %s10082_s21 }
 0x244   : > { %2670 = vrot.lane.b32.xlu1 %v9317_v45, %s10081_s20 }
 0x245   : > { %2828 = vrot.lane.b32.xlu0 %v2198_v51, %s10082_s21 }
 0x248   : > { %2668 = vrot.lane.b32.xlu1 %v2198_v51, %s10081_s20 }
 0x249   : > { %2992 = vrot.lane.b32.xlu0 %v9330_v50, %s10083_s22 }
 0x24c   : > { %2832 = vrot.lane.b32.xlu1 %v9330_v50, %s10082_s21 }
 0x24d   : > { %3150 = vrot.lane.b32.xlu0 %v9317_v45, %s10084_s23 }
 0x250   : > { %2990 = vrot.lane.b32.xlu1 %v9317_v45, %s10083_s22 }
 0x251   : > { %3148 = vrot.lane.b32.xlu0 %v2198_v51, %s10084_s23 }
 0x254   : > { %2988 = vrot.lane.b32.xlu1 %v2198_v51, %s10083_s22 }
 0x255   : > { %3312 = vrot.lane.b32.xlu0 %v9330_v50, %s10064_s30 }
 0x258   : > { %3152 = vrot.lane.b32.xlu1 %v9330_v50, %s10084_s23 }
 0x259   : > { %3468 = vrot.lane.b32.xlu0 %v2198_v51, %s10085_s24 }
 0x25c   : > { %3310 = vrot.lane.b32.xlu1 %v9317_v45, %s10064_s30 }
 0x25d   : > { %3470 = vrot.lane.b32.xlu0 %v9317_v45, %s10085_s24 }
 0x260   : > { %3308 = vrot.lane.b32.xlu1 %v2198_v51, %s10064_s30  ;;  %s8929_s30 = smov [#allocation4]  }
 0x264   : > { %3472 = vrot.lane.b32.xlu1 %v9330_v50, %s10085_s24 }
 0x268   : > { %3669 = vrot.lane.b32.xlu1 %v9369_v53, %s10066_s16 }
 0x26c   : > { %3667 = vrot.lane.b32.xlu1 %v9373_v54, %s10066_s16 }
 0x29f   : > { %v2209_v55 = vpop.permute.xlu0 %2208 }
 0x2a3   : > { %v2188_v56 = vpop.permute.xlu0 %2187 }
 0x2a4   : > { %v2190_v57 = vsel %vm451_vm10, %v2186_v52, %v2188_v56 }
 0x2a5   : > { %2196 = vst.msk [vmem:[#allocation3 + $0x10] sm:$0xff] %vm2178_vm13, %v2190_v57 }
 0x2a7   : > { %v2511_v58 = vpop.permute.xlu0 %2510 }
 0x2aa   : > { %v2211_v59 = vpop.permute.xlu1 %2210 }
 0x2ab   : > { %v2213_v60 = vsel %vm473_vm2, %v2209_v55, %v2211_v59  ;;  %v2509_v61 = vpop.permute.xlu0 %2508 }
 0x2ac   : > { %2221 = vmatprep.subr.mxu1 %v2213_v60  ;;  %v9380_v62 = vld [vmem:[#allocation3 + $0x10] sm:$0xff]  ;;  %v2514_v11 = vsel %vm820_vm3, %v2509_v61, %v2511_v58 }
 0x2ad   : > { %3671 = vrot.lane.b32.xlu0 %v9380_v62, %s10066_s16  ;;  %3972 = vrot.lane.b32.xlu1 %v9380_v62, %s10080_s15  ;;  %s10088_s16 = smov 127  }
 0x2ae   : > { %v2207_v63 = vpop.permute.xlu1 %2206 }
 0x2af   : > { %v2212_v2 = vsel %vm473_vm2, %v2207_v63, %v2209_v55  ;;  %v9390_v3 = vpop.permute.xlu0 %2672 }
 0x2b0   : > { %2222 = vmatpush1.msra.mxu1 %v2212_v2  ;;  %v8248_v2 = vld [vmem:[%s10042_s6 + $0x18] sm:$0xff] }
 0x2b1   : > { %8215 = vmatmul.mubr.msk.f32.vlgmr.msra.gmra.mrb[2].mxu1 %vm2217_vm15, %v8214_v0  ;;  %8466 = vmatprep.subr.mxu1 %v8917_v1 }
 0x2b2   : > { %8467 = vmatpush3.msra.mxu1 %v2211_v59  ;;  %v2513_v4 = vpop.permute.xlu1 %2512  ;;  %8468 = vmatprep.mubr.msk.f32.mxu1 %vm8928_vm14, %v8917_v1 }
 0x2b3   : > { %2365 = vmatprep.subr.mxu1 %v9317_v45  ;;  %3970 = vrot.lane.b32.xlu0 %v9369_v53, %s10080_s15  ;;  %v9399_v5 = vpop.permute.xlu0 %2830  ;;  %v2515_v9 = vsel %vm820_vm3, %v2511_v58, %v2513_v4  ;;  %v3658_v58 = vld [vmem:[%s10042_s6] sm:$0xff] }
 0x2b4   : > { %4130 = vrot.lane.b32.xlu1 %v9369_v53, %s10081_s20 }
 0x2b5   : > { %8469 = vmatmul.mubr.msk.f32.vlgmr.msra.gmra.mrb[4].mxu1 %vm2217_vm15, %v8214_v0 }
 0x2b6   : > { %2366 = vmatpush1.msra.mxu1 %v2198_v51  ;;  %v2671_v6 = vpop.permute.xlu1 %2670  ;;  %2429 = vmatprep.mubr.f32.mxu1 %v8917_v1  ;;  %v8240_v51 = vld [vmem:[%s10042_s6 + $0x8] sm:$0xff] }
 0x2b7   : > { %8471 = vmatprep.subr.mxu1 %v8917_v1  ;;  %3968 = vrot.lane.b32.xlu0 %v9373_v54, %s10080_s15  ;;  %v2829_v8 = vpop.permute.xlu0 %2828  ;;  %v2675_v16 = vsel %vm1007_vm4, %v2671_v6, %v9390_v3 }
 0x2b8   : > { %4128 = vrot.lane.b32.xlu1 %v9373_v54, %s10081_s20  ;;  %v2834_v30 = vsel %vm1194_vm5, %v2829_v8, %v9399_v5 }
 0x2b9   : > { %8217 = vmatmul.mubr.msk.f32.vlgmr.msra.gmra.mrb[2].mxu1 %vm2217_vm15, %v2197_v7 }
 0x2ba   : > { %8472 = vmatpush3.msra.mxu1 %v9330_v50  ;;  %v2669_v10 = vpop.permute.xlu1 %2668  ;;  %8473 = vmatprep.mubr.msk.f32.mxu1 %vm8928_vm14, %v8917_v1 }
 0x2bb   : > { %2522 = vmatprep.subr.mxu1 %v2515_v9  ;;  %4132 = vrot.lane.b32.xlu0 %v9380_v62, %s10081_s20  ;;  %v2993_v12 = vpop.permute.xlu0 %2992  ;;  %v2674_v19 = vsel %vm1007_vm4, %v2669_v10, %v2671_v6 }
 0x2bc   : > { %4292 = vrot.lane.b32.xlu1 %v9380_v62, %s10082_s21 }
 0x2bd   : > { %8474 = vmatmul.mubr.msk.f32.vlgmr.msra.gmra.mrb[6].mxu1 %vm2217_vm15, %v2197_v7 }
 0x2be   : > { %2523 = vmatpush1.msra.mxu1 %v2514_v11  ;;  %v2833_v14 = vpop.permute.xlu1 %2832  ;;  %2586 = vmatprep.mubr.f32.mxu1 %v8917_v1 }
 0x2bf   : > { %8487 = vmatpush3.msra.mxu0 %v2833_v14  ;;  %8476 = vmatprep.subr.mxu1 %v8917_v1  ;;  %v3151_v18 = vpop.permute.xlu0 %3150  ;;  %v2835_v26 = vsel %vm1194_vm5, %v9399_v5, %v2833_v14  ;;  %v8251_v5 = vld [vmem:[%s10042_s6 + $0x20] sm:$0xff] }
 0x2c0   : > { %8491 = vmatprep.subr.mxu0 %v8917_v1  ;;  %8489 = vmatmul.mubr.msk.f32.vlgmr.msra.gmra.mrb[4].mxu0 %vm2217_vm15, %v8225_v13 }
 0x2c1   : > { %8220 = vmatmul.mubr.msk.f32.vlgmr.msra.gmra.mrb[2].mxu1 %vm2217_vm15, %v8219_v15  ;;  %8492 = vmatpush3.msra.mxu0 %v2993_v12 }
 0x2c2   : > { %8477 = vmatpush3.msra.mxu1 %v2513_v4  ;;  %v2991_v17 = vpop.permute.xlu1 %2990  ;;  %8478 = vmatprep.mubr.msk.f32.mxu1 %vm8928_vm14, %v8917_v1 }
 0x2c3   : > { %2682 = vmatprep.subr.mxu1 %v2675_v16  ;;  %4290 = vrot.lane.b32.xlu0 %v9369_v53, %s10082_s21  ;;  %v3149_v25 = vpop.permute.xlu0 %3148  ;;  %v2995_v31 = vsel %vm1381_vm6, %v2991_v17, %v2993_v12 }
 0x2c4   : > { %4450 = vrot.lane.b32.xlu1 %v9369_v53, %s10083_s22  ;;  %8493 = vmatprep.mubr.msk.f32.mxu0 %vm8928_vm14, %v8917_v1  ;;  %v3154_v40 = vsel %vm1568_vm7, %v3149_v25, %v3151_v18 }
 0x2c5   : > { %8479 = vmatmul.mubr.msk.f32.vlgmr.msra.gmra.mrb[8].mxu1 %vm2217_vm15, %v8219_v15  ;;  %8496 = vmatprep.subr.mxu0 %v8917_v1 }
 0x2c6   : > { %2683 = vmatpush1.msra.mxu1 %v2674_v19  ;;  %v2989_v21 = vpop.permute.xlu1 %2988  ;;  %2746 = vmatprep.mubr.f32.mxu1 %v8917_v1 }
 0x2c7   : > { %8481 = vmatprep.subr.mxu1 %v8917_v1  ;;  %4288 = vrot.lane.b32.xlu0 %v9373_v54, %s10082_s21  ;;  %v3313_v33 = vpop.permute.xlu0 %3312  ;;  %v2994_v35 = vsel %vm1381_vm6, %v2989_v21, %v2991_v17  ;;  %v8257_v17 = vld [vmem:[%s10042_s6 + $0x30] sm:$0xff] }
 0x2c8   : > { %4448 = vrot.lane.b32.xlu1 %v9373_v54, %s10083_s22  ;;  %8494 = vmatmul.mubr.msk.f32.vlgmr.msra.gmra.mrb[6].mxu0 %vm2217_vm15, %v8228_v20 }
 0x2c9   : > { %8223 = vmatmul.mubr.msk.f32.vlgmr.msra.gmra.mrb[2].mxu1 %vm2217_vm15, %v8222_v23  ;;  %8498 = vmatprep.mubr.msk.f32.mxu0 %vm8928_vm14, %v8917_v1 }
 0x2ca   : > { %8482 = vmatpush3.msra.mxu1 %v9390_v3  ;;  %v3153_v27 = vpop.permute.xlu1 %3152  ;;  %8483 = vmatprep.mubr.msk.f32.mxu1 %vm8928_vm14, %v8917_v1 }
 0x2cb   : > { %2842 = vmatprep.subr.mxu1 %v2835_v26  ;;  %8497 = vmatpush3.msra.mxu0 %v3153_v27  ;;  %v3155_v36 = vsel %vm1568_vm7, %v3151_v18, %v3153_v27  ;;  %v3469_v43 = vpop.permute.xlu0 %3468  ;;  %v8260_v26 = vld [vmem:[%s10042_s6 + $0x38] sm:$0xff] }
 0x2cc   : > { %4452 = vrot.lane.b32.xlu0 %v9380_v62, %s10083_s22  ;;  %4612 = vrot.lane.b32.xlu1 %v9380_v62, %s10084_s23 }
 0x2cd   : > { %8484 = vmatmul.mubr.msk.f32.vlgmr.msra.gmra.mrb[10].mxu1 %vm2217_vm15, %v8222_v23  ;;  %8501 = vmatprep.subr.mxu0 %v8917_v1 }
 0x2ce   : > { %2843 = vmatpush1.msra.mxu1 %v2834_v30  ;;  %v3311_v32 = vpop.permute.xlu1 %3310  ;;  %2906 = vmatprep.mubr.f32.mxu1 %v8917_v1 }
 0x2cf   : > { %3002 = vmatprep.subr.mxu1 %v2995_v31  ;;  %8499 = vmatmul.mubr.msk.f32.vlgmr.msra.gmra.mrb[8].mxu0 %vm2217_vm15, %v8231_v28  ;;  %v3315_v41 = vsel %vm1755_vm8, %v3311_v32, %v3313_v33  ;;  %v3471_v45 = vpop.permute.xlu0 %3470  ;;  %v8263_v31 = vld [vmem:[%s10042_s6 + $0x40] sm:$0xff] }
 0x2d0   : > { %8502 = vmatpush3.msra.mxu0 %v3313_v33  ;;  %4610 = vrot.lane.b32.xlu0 %v9369_v53, %s10084_s23  ;;  %v3474_v48 = vsel %vm1942_vm9, %v3469_v43, %v3471_v45 }
 0x2d1   : > { %4770 = vrot.lane.b32.xlu1 %v9369_v53, %s10086_s1  ;;  %8226 = vmatmul.mubr.msk.f32.vlgmr.msra.gmra.mrb[2].mxu1 %vm2217_vm15, %v8225_v13  ;;  %v8254_v13 = vld [vmem:[%s10042_s6 + $0x28] sm:$0xff] }
 0x2d2   : > { %3003 = vmatpush1.msra.mxu1 %v2994_v35  ;;  %v3309_v37 = vpop.permute.xlu1 %3308  ;;  %8503 = vmatprep.mubr.msk.f32.mxu0 %vm8928_vm14, %v8917_v1 }
 0x2d3   : > { %3162 = vmatprep.subr.mxu1 %v3155_v36  ;;  %8504 = vmatmul.mubr.msk.f32.vlgmr.msra.gmra.mrb[10].mxu0 %vm2217_vm15, %v8234_v34  ;;  %v3314_v44 = vsel %vm1755_vm8, %v3309_v37, %v3311_v32 }
 0x2d4   : > { %4608 = vrot.lane.b32.xlu0 %v9373_v54, %s10084_s23  ;;  %8506 = vmatprep.subr.mxu0 %v8917_v1 }
 0x2d5   : > { %4768 = vrot.lane.b32.xlu1 %v9373_v54, %s10086_s1  ;;  %8508 = vmatprep.mubr.msk.f32.mxu0 %vm8928_vm14, %v8917_v1 }
 0x2d6   : > { %v3473_v39 = vpop.permute.xlu1 %3472  ;;  %3066 = vmatprep.mubr.f32.mxu1 %v8917_v1 }
 0x2d7   : > { %8507 = vmatpush3.msra.mxu0 %v3473_v39  ;;  %v3475_v47 = vsel %vm1942_vm9, %v3471_v45, %v3473_v39 }
 0x2d8   : > { %8509 = vmatmul.mubr.msk.f32.vlgmr.msra.gmra.mrb[12].mxu0 %vm2217_vm15, %v8237_v38  ;;  %4772 = vrot.lane.b32.xlu0 %v9380_v62, %s10086_s1 }
 0x2d9   : > { %4932 = vrot.lane.b32.xlu1 %v9380_v62, %s10085_s24  ;;  %8229 = vmatmul.mubr.msk.f32.vlgmr.msra.gmra.mrb[2].mxu1 %vm2217_vm15, %v8228_v20 }
 0x2da   : > { %3163 = vmatpush1.msra.mxu1 %v3154_v40  ;;  %3226 = vmatprep.mubr.f32.mxu1 %v8917_v1  ;;  %v3670_v49 = vpop.permute.xlu1 %3669 }
 0x2db   : > { %3322 = vmatprep.subr.mxu1 %v3315_v41  ;;  %8511 = vmatprep.subr.mxu0 %v8917_v1 }
 0x2dc   : > { %4930 = vrot.lane.b32.xlu0 %v9369_v53, %s10085_s24  ;;  %8513 = vmatprep.mubr.msk.f32.mxu0 %vm8928_vm14, %v8917_v1 }
 0x2dd   : > { %3629 = vperm.xlu1 %8819, %v3626_v42  }
 0x2de   : > { %v3668_v50 = vpop.permute.xlu1 %3667 }
 0x2df   : > { %v3673_v57 = vsel %vm473_vm2, %v3668_v50, %v3670_v49 }
 0x2e0   : > { %4928 = vrot.lane.b32.xlu0 %v9373_v54, %s10085_s24 }
 0x2e1   : > { %8232 = vmatmul.mubr.msk.f32.vlgmr.msra.gmra.mrb[2].mxu1 %vm2217_vm15, %v8231_v28 }
 0x2e2   : > { %3323 = vmatpush1.msra.mxu1 %v3314_v44  ;;  %3386 = vmatprep.mubr.f32.mxu1 %v8917_v1 }
 0x2e3   : > { %3482 = vmatprep.subr.mxu1 %v3475_v47 }
 0x2e4   : > { %5089 = vperm.xlu0 %8818, %v5086_v46  }
 0x2e9   : > { %8235 = vmatmul.mubr.msk.f32.vlgmr.msra.gmra.mrb[2].mxu1 %vm2217_vm15, %v8234_v34 }
 0x2ea   : > { %3483 = vmatpush1.msra.mxu1 %v3474_v48  ;;  %3546 = vmatprep.mubr.f32.mxu1 %v8917_v1 }
 0x2f1   : > { %8238 = vmatmul.mubr.msk.f32.vlgmr.msra.gmra.mrb[2].mxu1 %vm2217_vm15, %v8237_v38 }
 0x2f2   : > { %3745 = vmatprep.mubr.f32.mxu1 %v8917_v1 }
 0x31f   : > { %v3672_v52 = vpop.permute.xlu0 %3671  ;;  %v3973_v55 = vpop.permute.xlu1 %3972 }
 0x320   : > { %8512 = vmatpush3.msra.mxu0 %v3672_v52  ;;  %v3674_v56 = vsel %vm473_vm2, %v3670_v49, %v3672_v52 }
 0x321   : > { %3681 = vmatprep.subr.mxu1 %v3674_v56  ;;  %8514 = vmatmul.mubr.msk.f32.vlgmr.msra.gmra.mrb[14].mxu0 %vm2217_vm15, %v8240_v51 }
 0x322   : > { %8516 = vmatprep.subr.mxu0 %v8917_v1  ;;  %3682 = vmatpush1.msra.mxu1 %v3673_v57 }
 0x323   : > { %8517 = vmatpush3.msra.mxu0 %v9380_v62  ;;  %8241 = vmatmul.mubr.msk.f32.vlgmr.msra.gmra.mrb[12].mxu1 %vm2217_vm15, %v8240_v51 }
 0x324   : > { %3825 = vmatprep.subr.mxu1 %v9369_v53  ;;  %8518 = vmatprep.mubr.msk.f32.mxu0 %vm8928_vm14, %v8917_v1  ;;  %v8245_v53 = vld [vmem:[%s10042_s6 + $0x10] sm:$0xff] }
 0x325   : > { %v3971_v59 = vpop.permute.xlu0 %3970  ;;  %3826 = vmatpush1.msra.mxu1 %v9373_v54  ;;  %8521 = vmatprep.subr.mxu0 %v8917_v1 }
 0x326   : > { %v4131_v60 = vpop.permute.xlu1 %4130  ;;  %8519 = vmatmul.mubr.msk.f32.vlgmr.msra.gmra.mrb[16].mxu0 %vm2217_vm15, %v3658_v58  ;;  %v3975_v61 = vsel %vm820_vm3, %v3971_v59, %v3973_v55  ;;  %3889 = vmatprep.mubr.f32.mxu1 %v8917_v1 }
 0x327   : > { %3982 = vmatprep.subr.mxu1 %v3975_v61  ;;  %8522 = vmatpush3.msra.mxu0 %v3973_v55 }
 0x328   : > { %8523 = vmatprep.mubr.msk.f32.mxu0 %vm8928_vm14, %v8917_v1  ;;  %8526 = vmatprep.subr.mxu0 %v8917_v1 }
 0x329   : > { %v3969_v54 = vpop.permute.xlu0 %3968 }
 0x32a   : > { %v4129_v62 = vpop.permute.xlu1 %4128  ;;  %8524 = vmatmul.mubr.msk.f32.vlgmr.msra.gmra.mrb[18].mxu0 %vm2217_vm15, %v8245_v53  ;;  %v3974_v63 = vsel %vm820_vm3, %v3969_v54, %v3971_v59 }
 0x32b   : > { %8243 = vmatmul.mubr.msk.f32.vlgmr.msra.gmra.mrb[12].mxu1 %vm2217_vm15, %v3658_v58  ;;  %8528 = vmatprep.mubr.msk.f32.mxu0 %vm8928_vm14, %v8917_v1  ;;  %v4134_v6 = vsel %vm1007_vm4, %v4129_v62, %v4131_v60 }
 0x32c   : > { %3983 = vmatpush1.msra.mxu1 %v3974_v63  ;;  %4046 = vmatprep.mubr.f32.mxu1 %v8917_v1 }
 0x32d   : > { %v4133_v0 = vpop.permute.xlu0 %4132 }
 0x32e   : > { %8527 = vmatpush3.msra.mxu0 %v4133_v0  ;;  %v4135_v3 = vsel %vm1007_vm4, %v4131_v60, %v4133_v0  ;;  %v4293_v4 = vpop.permute.xlu1 %4292 }
 0x32f   : > { %4142 = vmatprep.subr.mxu1 %v4135_v3  ;;  %8531 = vmatprep.subr.mxu0 %v8917_v1 }
 0x330   : > { %8529 = vmatmul.mubr.msk.f32.vlgmr.msra.gmra.mrb[20].mxu0 %vm2217_vm15, %v8248_v2 }
 0x331   : > { %8532 = vmatpush3.msra.mxu0 %v4293_v4  ;;  %8533 = vmatprep.mubr.msk.f32.mxu0 %vm8928_vm14, %v8917_v1 }
 0x332   : > { %8536 = vmatprep.subr.mxu0 %v8917_v1 }
 0x333   : > { %8246 = vmatmul.mubr.msk.f32.vlgmr.msra.gmra.mrb[12].mxu1 %vm2217_vm15, %v8245_v53 }
 0x334   : > { %4143 = vmatpush1.msra.mxu1 %v4134_v6  ;;  %8534 = vmatmul.mubr.msk.f32.vlgmr.msra.gmra.mrb[22].mxu0 %vm2217_vm15, %v8251_v5 }
 0x335   : > { %v4291_v7 = vpop.permute.xlu0 %4290  ;;  %8538 = vmatprep.mubr.msk.f32.mxu0 %vm8928_vm14, %v8917_v1  ;;  %4206 = vmatprep.mubr.f32.mxu1 %v8917_v1 }
 0x336   : > { %v4451_v8 = vpop.permute.xlu1 %4450  ;;  %v4295_v9 = vsel %vm1194_vm5, %v4291_v7, %v4293_v4 }
 0x337   : > { %4302 = vmatprep.subr.mxu1 %v4295_v9 }
 0x339   : > { %v4289_v10 = vpop.permute.xlu0 %4288 }
 0x33a   : > { %v4449_v11 = vpop.permute.xlu1 %4448  ;;  %v4294_v12 = vsel %vm1194_vm5, %v4289_v10, %v4291_v7 }
 0x33b   : > { %8249 = vmatmul.mubr.msk.f32.vlgmr.msra.gmra.mrb[12].mxu1 %vm2217_vm15, %v8248_v2  ;;  %v4454_v19 = vsel %vm1381_vm6, %v4449_v11, %v4451_v8 }
 0x33c   : > { %4303 = vmatpush1.msra.mxu1 %v4294_v12  ;;  %4366 = vmatprep.mubr.f32.mxu1 %v8917_v1 }
 0x33e   : > { %v4453_v14 = vpop.permute.xlu0 %4452  ;;  %v4613_v15 = vpop.permute.xlu1 %4612 }
 0x33f   : > { %8537 = vmatpush3.msra.mxu0 %v4453_v14  ;;  %v4455_v16 = vsel %vm1381_vm6, %v4451_v8, %v4453_v14 }
 0x340   : > { %8541 = vmatprep.subr.mxu0 %v8917_v1  ;;  %8539 = vmatmul.mubr.msk.f32.vlgmr.msra.gmra.mrb[24].mxu0 %vm2217_vm15, %v8254_v13 }
 0x341   : > { %8542 = vmatpush3.msra.mxu0 %v4613_v15  ;;  %4462 = vmatprep.subr.mxu1 %v4455_v16 }
 0x342   : > { %v4611_v18 = vpop.permute.xlu0 %4610  ;;  %8543 = vmatprep.mubr.msk.f32.mxu0 %vm8928_vm14, %v8917_v1  ;;  %8546 = vmatprep.subr.mxu0 %v8917_v1 }
 0x343   : > { %v4771_v20 = vpop.permute.xlu1 %4770  ;;  %8252 = vmatmul.mubr.msk.f32.vlgmr.msra.gmra.mrb[12].mxu1 %vm2217_vm15, %v8251_v5  ;;  %v4615_v21 = vsel %vm1568_vm7, %v4611_v18, %v4613_v15 }
 0x344   : > { %8544 = vmatmul.mubr.msk.f32.vlgmr.msra.gmra.mrb[26].mxu0 %vm2217_vm15, %v8257_v17  ;;  %4463 = vmatpush1.msra.mxu1 %v4454_v19 }
 0x345   : > { %4622 = vmatprep.subr.mxu1 %v4615_v21  ;;  %8548 = vmatprep.mubr.msk.f32.mxu0 %vm8928_vm14, %v8917_v1 }
 0x346   : > { %v4609_v23 = vpop.permute.xlu0 %4608  ;;  %4526 = vmatprep.mubr.f32.mxu1 %v8917_v1 }
 0x347   : > { %v4769_v25 = vpop.permute.xlu1 %4768  ;;  %v4614_v30 = vsel %vm1568_vm7, %v4609_v23, %v4611_v18 }
 0x348   : > { %v4774_v34 = vsel %vm1755_vm8, %v4769_v25, %v4771_v20 }
 0x34a   : > { %v4773_v27 = vpop.permute.xlu0 %4772 }
 0x34b   : > { %8547 = vmatpush3.msra.mxu0 %v4773_v27  ;;  %8255 = vmatmul.mubr.msk.f32.vlgmr.msra.gmra.mrb[12].mxu1 %vm2217_vm15, %v8254_v13  ;;  %v4933_v28 = vpop.permute.xlu1 %4932  ;;  %v4775_v32 = vsel %vm1755_vm8, %v4771_v20, %v4773_v27 }
 0x34c   : > { %8549 = vmatmul.mubr.msk.f32.vlgmr.msra.gmra.mrb[28].mxu0 %vm2217_vm15, %v8260_v26  ;;  %8551 = vmatprep.subr.mxu0 %v8917_v1 }
 0x34d   : > { %8552 = vmatpush3.msra.mxu0 %v4933_v28  ;;  %8553 = vmatprep.mubr.msk.f32.mxu0 %vm8928_vm14, %v8917_v1 }
 0x34e   : > { %4623 = vmatpush1.msra.mxu1 %v4614_v30  ;;  %4686 = vmatprep.mubr.f32.mxu1 %v8917_v1  ;;  %v4931_v33 = vpop.permute.xlu0 %4930 }
 0x34f   : > { %4782 = vmatprep.subr.mxu1 %v4775_v32  ;;  %8556 = vmatprep.subr.mxu0 %v8917_v1  ;;  %v4935_v35 = vsel %vm1942_vm9, %v4931_v33, %v4933_v28 }
 0x350   : > { %8554 = vmatmul.mubr.msk.f32.vlgmr.msra.gmra.mrb[30].mxu0 %vm2217_vm15, %v8263_v31 }
 0x351   : > { %8558 = vmatprep.mubr.msk.f32.mxu0 %vm8928_vm14, %v8917_v1 }
 0x352   : > { %v4929_v36 = vpop.permute.xlu0 %4928 }
 0x353   : > { %8258 = vmatmul.mubr.msk.f32.vlgmr.msra.gmra.mrb[12].mxu1 %vm2217_vm15, %v8257_v17  ;;  %v4934_v37 = vsel %vm1942_vm9, %v4929_v36, %v4931_v33 }
 0x354   : > { %4783 = vmatpush1.msra.mxu1 %v4774_v34  ;;  %4846 = vmatprep.mubr.f32.mxu1 %v8917_v1 }
 0x355   : > { %4942 = vmatprep.subr.mxu1 %v4935_v35 }
 0x35b   : > { %8261 = vmatmul.mubr.msk.f32.vlgmr.msra.gmra.mrb[12].mxu1 %vm2217_vm15, %v8260_v26 }
 0x35c   : > { %4943 = vmatpush1.msra.mxu1 %v4934_v37  ;;  %5006 = vmatprep.mubr.f32.mxu1 %v8917_v1  ;;  %v3630_v0 = vpop.permute.xlu1 %3629 }
 0x363   : > { %8264 = vmatmul.mubr.msk.f32.vlgmr.msra.gmra.mrb[12].mxu1 %vm2217_vm15, %v8263_v31 }
 0x364   : > { %5205 = vmatprep.mubr.f32.mxu1 %v8917_v1 }
 0x388   : > { %v2358_v38 = vpop.f32.mrb[4].mxu1 }
 0x389   : > { %v8470_v39 = vpop.f32.mrb[5].mxu1 }
 0x390   : > { %v2502_v40 = vpop.f32.mrb[6].mxu1 }
 0x391   : > { %v2503_v41 = vadd.f32 %v2502_v40, %v2358_v38  ;;  %v8475_v42 = vpop.f32.mrb[7].mxu1 }
 0x392   : > { %v5090_v42 = vpop.permute.xlu0 %5089 }
 0x393   : > { %v2979_v43 = vpop.f32.mrb[4].mxu0 }
 0x394   : > { %v8490_v44 = vpop.f32.mrb[5].mxu0 }
 0x398   : > { %v2659_v45 = vpop.f32.mrb[8].mxu1 }
 0x399   : > { %v2665_v46 = vadd.f32 %v2659_v45, %v2503_v41  ;;  %v8480_v47 = vpop.f32.mrb[9].mxu1 }
 0x39b   : > { %v3139_v48 = vpop.f32.mrb[6].mxu0 }
 0x39c   : > { %v8495_v49 = vpop.f32.mrb[7].mxu0 }
 0x3a0   : > { %v2819_v50 = vpop.f32.mrb[10].mxu1 }
 0x3a1   : > { %v2825_v51 = vadd.f32 %v2819_v50, %v2665_v46  ;;  %v8485_v52 = vpop.f32.mrb[11].mxu1 }
 0x3a2   : > { %v3299_v55 = vpop.f32.mrb[8].mxu0 }
 0x3a3   : > { %v2985_v56 = vadd.f32 %v2979_v43, %v2825_v51  ;;  %v8500_v57 = vpop.f32.mrb[9].mxu0 }
 0x3a5   : > { %v3145_v58 = vadd.f32 %v3139_v48, %v2985_v56 }
 0x3a6   : > { %v3459_v59 = vpop.f32.mrb[10].mxu0 }
 0x3a7   : > { %v3305_v60 = vadd.f32 %v3299_v55, %v3145_v58  ;;  %v8505_v61 = vpop.f32.mrb[11].mxu0 }
 0x3a9   : > { %v3465_v53 = vadd.f32 %v3459_v59, %v3305_v60 }
 0x3ab   : > { %v3619_v54 = vpop.f32.mrb[12].mxu0 }
 0x3ac   : > { %v3625_v62 = vadd.f32 %v3619_v54, %v3465_v53  ;;  %v8510_v63 = vpop.f32.mrb[13].mxu0 }
 0x3ae   : > { %v3634_v3 = vadd.f32 %v3630_v0, %v3625_v62 }
 0x3b0   : > { %v3637_v9 = vmax.f32 %v3634_v3, 0.0 }
 0x3b2   : > { %v3640_v12 = vmul.f32 %v3637_v9, %v9303_v29 }
 0x3c4   : > { %v3548_v2 = vpop.f32.mrb[2].mxu1 }
 0x3c5   : > { %v3632_v4 = vadd.f32 %v3630_v0, %v3548_v2  ;;  %v3550_v5 = vpop.f32.mrb[3].mxu1 }
 0x3c6   : > { %v3633_v6 = vadd.f32 %v3630_v0, %v3550_v5 }
 0x3c7   : > { %v3635_v7 = vmax.f32 %v3632_v4, 0.0  ;;  %v8266_v4 = vld [vmem:[%s10044_s8 + $0x4] sm:$0xf] }
 0x3c8   : > { %v3636_v8 = vmax.f32 %v3633_v6, 0.0 }
 0x3c9   : > { %v3638_v10 = vmul.f32 %v3635_v7, %v9299_v22 }
 0x3ca   : > { %v3639_v11 = vmul.f32 %v3636_v8, %v9301_v24 }
 0x3cb   : > { %3644 = vrot.lane.b32.xlu1 %v3638_v10, %s10087_s2  ;;  %v5118_v10 = vld [vmem:[%s10044_s8] sm:$0xf] }
 0x3cc   : > { %3646 = vrot.lane.b32.xlu0 %v3639_v11, %s10087_s2 }
 0x3cf   : > { %3648 = vrot.lane.b32.xlu1 %v3640_v12, %s10087_s2 }
 0x3f4   : > { %v3818_v13 = vpop.f32.mrb[14].mxu0 }
 0x3f5   : > { %v8515_v14 = vpop.f32.mrb[15].mxu0 }
 0x3f6   : > { %v8271_v14 = vld [vmem:[%s10044_s8 + $0x8] sm:$0xf] }
 0x3f9   : > { %v3962_v15 = vpop.f32.mrb[16].mxu0 }
 0x3fa   : > { %v3963_v16 = vadd.f32 %v3962_v15, %v3818_v13  ;;  %v8520_v17 = vpop.f32.mrb[17].mxu0 }
 0x3fb   : > { %v8274_v17 = vld [vmem:[%s10044_s8 + $0xc] sm:$0xf] }
 0x3fd   : > { %v4119_v18 = vpop.f32.mrb[18].mxu0 }
 0x3fe   : > { %v4125_v19 = vadd.f32 %v4119_v18, %v3963_v16  ;;  %v8525_v20 = vpop.f32.mrb[19].mxu0 }
 0x403   : > { %v4279_v21 = vpop.f32.mrb[20].mxu0 }
 0x404   : > { %v4285_v23 = vadd.f32 %v4279_v21, %v4125_v19  ;;  %v8530_v25 = vpop.f32.mrb[21].mxu0 }
 0x405   : > { %v8277_v25 = vld [vmem:[%s10044_s8 + $0x10] sm:$0xf] }
 0x407   : > { %v4439_v26 = vpop.f32.mrb[22].mxu0 }
 0x408   : > { %v4445_v27 = vadd.f32 %v4439_v26, %v4285_v23  ;;  %v8535_v28 = vpop.f32.mrb[23].mxu0 }
 0x413   : > { %v4599_v30 = vpop.f32.mrb[24].mxu0 }
 0x414   : > { %v4605_v31 = vadd.f32 %v4599_v30, %v4445_v27  ;;  %v8540_v32 = vpop.f32.mrb[25].mxu0 }
 0x415   : > { %v8280_v32 = vld [vmem:[%s10044_s8 + $0x14] sm:$0xf] }
 0x417   : > { %v4759_v33 = vpop.f32.mrb[26].mxu0 }
 0x418   : > { %v4765_v34 = vadd.f32 %v4759_v33, %v4605_v31  ;;  %v8545_v35 = vpop.f32.mrb[27].mxu0 }
 0x41f   : > { %v4919_v36 = vpop.f32.mrb[28].mxu0 }
 0x420   : > { %v4925_v37 = vadd.f32 %v4919_v36, %v4765_v34  ;;  %v8550_v38 = vpop.f32.mrb[29].mxu0 }
 0x421   : > { %v8283_v38 = vld [vmem:[%s10044_s8 + $0x18] sm:$0xf] }
 0x423   : > { %v5079_v39 = vpop.f32.mrb[30].mxu0 }
 0x424   : > { %v5085_v40 = vadd.f32 %v5079_v39, %v4925_v37  ;;  %v8555_v41 = vpop.f32.mrb[31].mxu0 }
 0x425   : > { %v8286_v41 = vld [vmem:[%s10044_s8 + $0x1c] sm:$0xf] }
 0x426   : > { %v5094_v49 = vadd.f32 %v5090_v42, %v5085_v40 }
 0x428   : > { %v5097_v56 = vmax.f32 %v5094_v49, 0.0 }
 0x436   : > { %v5008_v43 = vpop.f32.mrb[12].mxu1 }
 0x437   : > { %v5092_v44 = vadd.f32 %v5090_v42, %v5008_v43  ;;  %v5010_v45 = vpop.f32.mrb[13].mxu1 }
 0x438   : > { %v5093_v46 = vadd.f32 %v5090_v42, %v5010_v45  ;;  %v8289_v45 = vld [vmem:[%s10044_s8 + $0x20] sm:$0xf] }
 0x439   : > { %v5095_v47 = vmax.f32 %v5092_v44, 0.0 }
 0x43a   : > { %v5096_v48 = vmax.f32 %v5093_v46, 0.0 }
 0x43b   : > { %v5098_v50 = vmul.f32 %v5095_v47, %v9299_v22 }
 0x43c   : > { %v5099_v51 = vmul.f32 %v5096_v48, %v9301_v24  ;;  %v5100_v24 = vmul.f32 %v5097_v56, %v9303_v29  ;;  %v6546_v48 = vld [vmem:[%s10045_s9] sm:$0xf] }
 0x43d   : > { %v3645_v52 = vpop.permute.xlu1 %3644  ;;  %5104 = vrot.lane.b32.xlu0 %v5098_v50, %s10087_s2 }
 0x43e   : > { %3655 = vst.msk [vmem:[#allocation2] sm:$0xff] %vm2175_vm12, %v3645_v52  ;;  %v3647_v55 = vpop.permute.xlu0 %3646  ;;  %5106 = vrot.lane.b32.xlu1 %v5099_v51, %s10087_s2  ;;  %v7990_v51 = vld [vmem:[%s10047_s11] sm:$0xf] }
 0x43f   : > { %v9650_v57 = vsel %vm451_vm10, %v3645_v52, %v3647_v55 }
 0x441   : > { %v3649_v58 = vpop.permute.xlu1 %3648  ;;  %5129 = vrot.lane.b32.xlu0 %v9650_v57, %s10088_s16 }
 0x442   : > { %v3651_v22 = vsel %vm451_vm10, %v3647_v55, %v3649_v58 }
 0x443   : > { %3657 = vst.msk [vmem:[#allocation2 + $0x10] sm:$0xff] %vm2178_vm13, %v3651_v22 }
 0x445   : > { %5108 = vrot.lane.b32.xlu0 %v5100_v24, %s10087_s2  ;;  %v5119_v60 = vld [vmem:[#allocation2] sm:$0xff] }
 0x446   : > { %v8292_v24 = vld [vmem:[%s10046_s10 + $0x4] sm:$0xf] }
 0x449   : > { %5430 = vrot.lane.b32.xlu0 %v9650_v57, %s10080_s15 }
 0x44a   : > { %v5121_v59 = vld [vmem:[#allocation2 + $0x10] sm:$0xff] }
 0x44b   : > { %5131 = vrot.lane.b32.xlu1 %v5121_v59, %s10088_s16 }
 0x44d   : > { %5428 = vrot.lane.b32.xlu0 %v5119_v60, %s10080_s15 }
 0x44f   : > { %5127 = vrot.lane.b32.xlu1 %v5119_v60, %s10088_s16 }
 0x451   : > { %5592 = vrot.lane.b32.xlu0 %v5121_v59, %s10081_s20 }
 0x453   : > { %5432 = vrot.lane.b32.xlu1 %v5121_v59, %s10080_s15 }
 0x455   : > { %5750 = vrot.lane.b32.xlu0 %v9650_v57, %s10082_s21 }
 0x457   : > { %5590 = vrot.lane.b32.xlu1 %v9650_v57, %s10081_s20 }
 0x459   : > { %5748 = vrot.lane.b32.xlu0 %v5119_v60, %s10082_s21 }
 0x45b   : > { %5588 = vrot.lane.b32.xlu1 %v5119_v60, %s10081_s20 }
 0x45d   : > { %5912 = vrot.lane.b32.xlu0 %v5121_v59, %s10083_s22 }
 0x45f   : > { %5752 = vrot.lane.b32.xlu1 %v5121_v59, %s10082_s21 }
 0x461   : > { %6070 = vrot.lane.b32.xlu0 %v9650_v57, %s10084_s23 }
 0x463   : > { %5910 = vrot.lane.b32.xlu1 %v9650_v57, %s10083_s22 }
 0x465   : > { %6068 = vrot.lane.b32.xlu0 %v5119_v60, %s10084_s23 }
 0x467   : > { %5908 = vrot.lane.b32.xlu1 %v5119_v60, %s10083_s22 }
 0x469   : > { %6232 = vrot.lane.b32.xlu0 %v5121_v59, %s10086_s1 }
 0x46b   : > { %6072 = vrot.lane.b32.xlu1 %v5121_v59, %s10084_s23 }
 0x46d   : > { %6388 = vrot.lane.b32.xlu0 %v5119_v60, %s10085_s24 }
 0x46f   : > { %6230 = vrot.lane.b32.xlu1 %v9650_v57, %s10086_s1 }
 0x471   : > { %6390 = vrot.lane.b32.xlu0 %v9650_v57, %s10085_s24 }
 0x473   : > { %6228 = vrot.lane.b32.xlu1 %v5119_v60, %s10086_s1 }
 0x477   : > { %6392 = vrot.lane.b32.xlu1 %v5121_v59, %s10085_s24 }
 0x4af   : > { %v5105_v29 = vpop.permute.xlu0 %5104 }
 0x4b0   : > { %5115 = vst.msk [vmem:[#allocation3] sm:$0xff] %vm2175_vm12, %v5105_v29  ;;  %v5107_v61 = vpop.permute.xlu1 %5106 }
 0x4b1   : > { %v9690_v53 = vsel %vm451_vm10, %v5105_v29, %v5107_v61 }
 0x4b2   : > { %6573 = vrot.lane.b32.xlu1 %v9690_v53, %s10088_s16 }
 0x4b3   : > { %v5130_v54 = vpop.permute.xlu0 %5129 }
 0x4b7   : > { %v5109_v62 = vpop.permute.xlu0 %5108  ;;  %v9694_v63 = vld [vmem:[#allocation3] sm:$0xff] }
 0x4b8   : > { %v5111_v0 = vsel %vm451_vm10, %v5107_v61, %v5109_v62  ;;  %6571 = vrot.lane.b32.xlu1 %v9694_v63, %s10088_s16 }
 0x4b9   : > { %5117 = vst.msk [vmem:[#allocation3 + $0x10] sm:$0xff] %vm2178_vm13, %v5111_v0 }
 0x4bb   : > { %v5431_v2 = vpop.permute.xlu0 %5430 }
 0x4bd   : > { %v5132_v3 = vpop.permute.xlu1 %5131 }
 0x4be   : > { %8557 = vmatpush3.msra.mxu0 %v5132_v3  ;;  %v5134_v5 = vsel %vm473_vm2, %v5130_v54, %v5132_v3 }
 0x4bf   : > { %5141 = vmatprep.subr.mxu1 %v5134_v5  ;;  %8561 = vmatprep.subr.mxu0 %v8917_v1  ;;  %v5429_v6 = vpop.permute.xlu0 %5428 }
 0x4c0   : > { %8559 = vmatmul.mubr.msk.f32.vlgmr.msra.gmra.mrb[32].mxu0 %vm2217_vm15, %v8266_v4  ;;  %v9706_v7 = vld [vmem:[#allocation3 + $0x10] sm:$0xff]  ;;  %v5434_v19 = vsel %vm820_vm3, %v5429_v6, %v5431_v2 }
 0x4c1   : > { %8562 = vmatpush3.msra.mxu0 %v5121_v59  ;;  %v5128_v8 = vpop.permute.xlu1 %5127  ;;  %8563 = vmatprep.mubr.msk.f32.mxu0 %vm8928_vm14, %v8917_v1  ;;  %v8300_v6 = vld [vmem:[%s10046_s10 + $0xc] sm:$0xf] }
 0x4c2   : > { %v5133_v9 = vsel %vm473_vm2, %v5128_v8, %v5130_v54  ;;  %8566 = vmatprep.subr.mxu0 %v8917_v1  ;;  %6575 = vrot.lane.b32.xlu0 %v9706_v7, %s10088_s16  ;;  %v6562_v54 = vld [vmem:[%s10046_s10] sm:$0xf]  ;;  %s10069_s16 = smul.u32 192, %s9022_s29 }
 0x4c3   : > { %5142 = vmatpush1.msra.mxu1 %v5133_v9  ;;  %6876 = vrot.lane.b32.xlu1 %v9706_v7, %s10080_s15  ;;  %v5593_v11 = vpop.permute.xlu0 %5592  ;;  %v8303_v9 = vld [vmem:[%s10046_s10 + $0x10] sm:$0xf] }
 0x4c4   : > { %8267 = vmatmul.mubr.msk.f32.vlgmr.msra.gmra.mrb[14].mxu1 %vm2217_vm15, %v8266_v4  ;;  %5285 = vmatprep.subr.mxu1 %v9650_v57 }
 0x4c5   : > { %5286 = vmatpush1.msra.mxu1 %v5119_v60  ;;  %v5433_v12 = vpop.permute.xlu1 %5432  ;;  %8564 = vmatmul.mubr.msk.f32.vlgmr.msra.gmra.mrb[34].mxu0 %vm2217_vm15, %v5118_v10 }
 0x4c6   : > { %8567 = vmatpush3.msra.mxu0 %v5433_v12  ;;  %v5435_v13 = vsel %vm820_vm3, %v5431_v2, %v5433_v12  ;;  %5349 = vmatprep.mubr.f32.mxu1 %v8917_v1 }
 0x4c7   : > { %5442 = vmatprep.subr.mxu1 %v5435_v13  ;;  %8568 = vmatprep.mubr.msk.f32.mxu0 %vm8928_vm14, %v8917_v1  ;;  %v5751_v15 = vpop.permute.xlu0 %5750 }
 0x4c8   : > { %8571 = vmatprep.subr.mxu0 %v8917_v1  ;;  %6874 = vrot.lane.b32.xlu0 %v9690_v53, %s10080_s15 }
 0x4c9   : > { %v5591_v16 = vpop.permute.xlu1 %5590  ;;  %8569 = vmatmul.mubr.msk.f32.vlgmr.msra.gmra.mrb[36].mxu0 %vm2217_vm15, %v8271_v14  ;;  %7034 = vrot.lane.b32.xlu1 %v9690_v53, %s10081_s20 }
 0x4ca   : > { %8572 = vmatpush3.msra.mxu0 %v5593_v11  ;;  %8573 = vmatprep.mubr.msk.f32.mxu0 %vm8928_vm14, %v8917_v1  ;;  %v5595_v20 = vsel %vm1007_vm4, %v5591_v16, %v5593_v11 }
 0x4cb   : > { %8576 = vmatprep.subr.mxu0 %v8917_v1  ;;  %v5749_v18 = vpop.permute.xlu0 %5748 }
 0x4cc   : > { %8269 = vmatmul.mubr.msk.f32.vlgmr.msra.gmra.mrb[14].mxu1 %vm2217_vm15, %v5118_v10  ;;  %6872 = vrot.lane.b32.xlu0 %v9694_v63, %s10080_s15  ;;  %v5754_v35 = vsel %vm1194_vm5, %v5749_v18, %v5751_v15 }
 0x4cd   : > { %5443 = vmatpush1.msra.mxu1 %v5434_v19  ;;  %v5589_v21 = vpop.permute.xlu1 %5588  ;;  %7032 = vrot.lane.b32.xlu1 %v9694_v63, %s10081_s20 }
 0x4ce   : > { %5602 = vmatprep.subr.mxu1 %v5595_v20  ;;  %8574 = vmatmul.mubr.msk.f32.vlgmr.msra.gmra.mrb[38].mxu0 %vm2217_vm15, %v8274_v17  ;;  %v5594_v27 = vsel %vm1007_vm4, %v5589_v21, %v5591_v16  ;;  %v8306_v16 = vld [vmem:[%s10046_s10 + $0x14] sm:$0xf]  ;;  %v8309_v21 = vld [vmem:[%s10046_s10 + $0x18] sm:$0xf] }
 0x4cf   : > { %5506 = vmatprep.mubr.f32.mxu1 %v8917_v1  ;;  %v5913_v23 = vpop.permute.xlu0 %5912  ;;  %8578 = vmatprep.mubr.msk.f32.mxu0 %vm8928_vm14, %v8917_v1 }
 0x4d0   : > { %7036 = vrot.lane.b32.xlu0 %v9706_v7, %s10081_s20 }
 0x4d1   : > { %v5753_v26 = vpop.permute.xlu1 %5752  ;;  %7196 = vrot.lane.b32.xlu1 %v9706_v7, %s10082_s21 }
 0x4d2   : > { %8577 = vmatpush3.msra.mxu0 %v5753_v26  ;;  %v5755_v30 = vsel %vm1194_vm5, %v5751_v15, %v5753_v26 }
 0x4d3   : > { %8581 = vmatprep.subr.mxu0 %v8917_v1  ;;  %8579 = vmatmul.mubr.msk.f32.vlgmr.msra.gmra.mrb[40].mxu0 %vm2217_vm15, %v8277_v25  ;;  %v6071_v28 = vpop.permute.xlu0 %6070 }
 0x4d4   : > { %8272 = vmatmul.mubr.msk.f32.vlgmr.msra.gmra.mrb[14].mxu1 %vm2217_vm15, %v8271_v14  ;;  %8582 = vmatpush3.msra.mxu0 %v5913_v23 }
 0x4d5   : > { %5603 = vmatpush1.msra.mxu1 %v5594_v27  ;;  %v5911_v31 = vpop.permute.xlu1 %5910  ;;  %7194 = vrot.lane.b32.xlu0 %v9690_v53, %s10082_s21 }
 0x4d6   : > { %5762 = vmatprep.subr.mxu1 %v5755_v30  ;;  %7354 = vrot.lane.b32.xlu1 %v9690_v53, %s10083_s22  ;;  %v5915_v36 = vsel %vm1381_vm6, %v5911_v31, %v5913_v23 }
 0x4d7   : > { %5666 = vmatprep.mubr.f32.mxu1 %v8917_v1  ;;  %8583 = vmatprep.mubr.msk.f32.mxu0 %vm8928_vm14, %v8917_v1  ;;  %v6069_v34 = vpop.permute.xlu0 %6068 }
 0x4d8   : > { %8586 = vmatprep.subr.mxu0 %v8917_v1  ;;  %8584 = vmatmul.mubr.msk.f32.vlgmr.msra.gmra.mrb[42].mxu0 %vm2217_vm15, %v8280_v32  ;;  %v6074_v47 = vsel %vm1568_vm7, %v6069_v34, %v6071_v28  ;;  %v8315_v34 = vld [vmem:[%s10046_s10 + $0x20] sm:$0xf] }
 0x4d9   : > { %v5909_v33 = vpop.permute.xlu1 %5908  ;;  %7192 = vrot.lane.b32.xlu0 %v9694_v63, %s10082_s21  ;;  %8588 = vmatprep.mubr.msk.f32.mxu0 %vm8928_vm14, %v8917_v1 }
 0x4da   : > { %7352 = vrot.lane.b32.xlu1 %v9694_v63, %s10083_s22  ;;  %v5914_v42 = vsel %vm1381_vm6, %v5909_v33, %v5911_v31  ;;  %v8312_v31 = vld [vmem:[%s10046_s10 + $0x1c] sm:$0xf] }
 0x4db   : > { %v6233_v39 = vpop.permute.xlu0 %6232 }
 0x4dc   : > { %8275 = vmatmul.mubr.msk.f32.vlgmr.msra.gmra.mrb[14].mxu1 %vm2217_vm15, %v8274_v17 }
 0x4dd   : > { %5763 = vmatpush1.msra.mxu1 %v5754_v35  ;;  %v6073_v37 = vpop.permute.xlu1 %6072  ;;  %7356 = vrot.lane.b32.xlu0 %v9706_v7, %s10083_s22  ;;  %s9959_s22 = scalar_lea.hbm %s10048_s12, %s10069_s16 }
 0x4de   : > { %5922 = vmatprep.subr.mxu1 %v5915_v36  ;;  %8587 = vmatpush3.msra.mxu0 %v6073_v37  ;;  %v6075_v43 = vsel %vm1568_vm7, %v6071_v28, %v6073_v37 }
 0x4df   : > { %7516 = vrot.lane.b32.xlu1 %v9706_v7, %s10084_s23  ;;  %5826 = vmatprep.mubr.f32.mxu1 %v8917_v1  ;;  %v6389_v50 = vpop.permute.xlu0 %6388 }
 0x4e0   : > { %8589 = vmatmul.mubr.msk.f32.vlgmr.msra.gmra.mrb[44].mxu0 %vm2217_vm15, %v8283_v38  ;;  %8591 = vmatprep.subr.mxu0 %v8917_v1 }
 0x4e1   : > { %v6231_v40 = vpop.permute.xlu1 %6230  ;;  %8592 = vmatpush3.msra.mxu0 %v6233_v39  ;;  %7514 = vrot.lane.b32.xlu0 %v9690_v53, %s10084_s23 }
 0x4e2   : > { %8593 = vmatprep.mubr.msk.f32.mxu0 %vm8928_vm14, %v8917_v1  ;;  %8596 = vmatprep.subr.mxu0 %v8917_v1  ;;  %v6235_v49 = vsel %vm1755_vm8, %v6231_v40, %v6233_v39 }
 0x4e3   : > { %7674 = vrot.lane.b32.xlu1 %v9690_v53, %s10086_s1  ;;  %v6391_v55 = vpop.permute.xlu0 %6390 }
 0x4e4   : > { %8278 = vmatmul.mubr.msk.f32.vlgmr.msra.gmra.mrb[14].mxu1 %vm2217_vm15, %v8277_v25  ;;  %8594 = vmatmul.mubr.msk.f32.vlgmr.msra.gmra.mrb[46].mxu0 %vm2217_vm15, %v8286_v41  ;;  %v6394_v57 = vsel %vm1942_vm9, %v6389_v50, %v6391_v55 }
 0x4e5   : > { %5923 = vmatpush1.msra.mxu1 %v5914_v42  ;;  %v6229_v44 = vpop.permute.xlu1 %6228  ;;  %7512 = vrot.lane.b32.xlu0 %v9694_v63, %s10084_s23  ;;  %s9947_s23 = sand.u32 1, %s8907_s26  }
 0x4e6   : > { %6082 = vmatprep.subr.mxu1 %v6075_v43  ;;  %8598 = vmatprep.mubr.msk.f32.mxu0 %vm8928_vm14, %v8917_v1  ;;  %v6234_v52 = vsel %vm1755_vm8, %v6229_v44, %v6231_v40  ;;  %s10068_s20 = smul.u32 12, %s9947_s23  ;;  %s8006_s0 = scalar_lea.sflag [#allocation5], %s9947_s23 }
 0x4e7   : > { %7672 = vrot.lane.b32.xlu1 %v9694_v63, %s10086_s1  ;;  %5986 = vmatprep.mubr.f32.mxu1 %v8917_v1 }
 0x4e9   : > { %v6393_v46 = vpop.permute.xlu1 %6392  ;;  %7676 = vrot.lane.b32.xlu0 %v9706_v7, %s10086_s1  ;;  %s437_s1 = scalar_lea.vmem [#allocation4], %s10068_s20  ;;  %s8825_s20 = sshll.u32 %s8929_s30, 4  ;;  %s8826_s20 = int_to_ptr.vmem [resolvable:$false] %s8825_s20 }
 0x4ea   : > { %8597 = vmatpush3.msra.mxu0 %v6393_v46  ;;  %v6395_v56 = vsel %vm1942_vm9, %v6391_v55, %v6393_v46  ;;  %s8827_s3 = scalar_lea.vmem %s8826_s20, 384 }
 0x4eb   : > { %8599 = vmatmul.mubr.msk.f32.vlgmr.msra.gmra.mrb[48].mxu0 %vm2217_vm15, %v8289_v45  ;;  %7836 = vrot.lane.b32.xlu1 %v9706_v7, %s10085_s24 }
 0x4ec   : > { %8281 = vmatmul.mubr.msk.f32.vlgmr.msra.gmra.mrb[14].mxu1 %vm2217_vm15, %v8280_v32  ;;  %8601 = vmatprep.subr.mxu0 %v8917_v1 }
 0x4ed   : > { %6083 = vmatpush1.msra.mxu1 %v6074_v47  ;;  %7834 = vrot.lane.b32.xlu0 %v9690_v53, %s10085_s24 }
 0x4ee   : > { %6242 = vmatprep.subr.mxu1 %v6235_v49  ;;  %6146 = vmatprep.mubr.f32.mxu1 %v8917_v1 }
 0x4ef   : > { %6549 = vperm.xlu1 %8819, %v6546_v48   ;;  %8603 = vmatprep.mubr.msk.f32.mxu0 %vm8928_vm14, %v8917_v1 }
 0x4f1   : > { %7832 = vrot.lane.b32.xlu0 %v9694_v63, %s10085_s24  ;;  %s8025_s24 = sshll.u32 %s437_s1, 4  ;;  %s9961_s24 = int_to_ptr.vmem [resolvable:$true] %s8025_s24 }
 0x4f2   : > { %s8821_s15 = scalar_lea.vmem %s9961_s24, 192  ;;  %p8828_p0 = scmp.lt.s32.totalorder %s9961_s24, %s8826_s20 }
 0x4f3   : > { %p8822_p11 = scmp.ne.s32.totalorder %s9961_s24, %s8821_s15  ;;  %p8829_p1 = scmp.lt.s32.totalorder %s8827_s3, %s8821_s15 }
 0x4f4   : > { %8284 = vmatmul.mubr.msk.f32.vlgmr.msra.gmra.mrb[14].mxu1 %vm2217_vm15, %v8283_v38 }
 0x4f5   : > { %6243 = vmatpush1.msra.mxu1 %v6234_v52  ;;  %7993 = vperm.xlu0 %8818, %v7990_v51   ;;  %p8823_p12 = pnand %p8822_p11, %p9039_p5  ;;  %p8830_p2 = por %p8829_p1, %p8828_p0 }
 0x4f6   : > { %6402 = vmatprep.subr.mxu1 %v6395_v56  ;;  %6306 = vmatprep.mubr.f32.mxu1 %v8917_v1 }
 0x4f7   : > { %p8824_p13 = pneg %p8823_p12 }
 0x4f9   : > { %p8831_p3 = pnand %p8830_p2, %p8824_p13 }
 0x4fc   : > { %8287 = vmatmul.mubr.msk.f32.vlgmr.msra.gmra.mrb[14].mxu1 %vm2217_vm15, %v8286_v41 }
 0x4fd   : > { %6403 = vmatpush1.msra.mxu1 %v6394_v57  ;;  %6466 = vmatprep.mubr.f32.mxu1 %v8917_v1 }
 0x504   : > { %8290 = vmatmul.mubr.msk.f32.vlgmr.msra.gmra.mrb[14].mxu1 %vm2217_vm15, %v8289_v45 }
 0x505   : > { %6649 = vmatprep.mubr.f32.mxu1 %v8917_v1 }
 0x524   : > { %v6574_v58 = vpop.permute.xlu1 %6573 }
 0x52a   : > { %v6572_v22 = vpop.permute.xlu1 %6571 }
 0x52b   : > { %v6577_v61 = vsel %vm473_vm2, %v6572_v22, %v6574_v58 }
 0x534   : > { %v6576_v59 = vpop.permute.xlu0 %6575 }
 0x535   : > { %8602 = vmatpush3.msra.mxu0 %v6576_v59  ;;  %v6877_v60 = vpop.permute.xlu1 %6876  ;;  %v6578_v29 = vsel %vm473_vm2, %v6574_v58, %v6576_v59 }
 0x536   : > { %6585 = vmatprep.subr.mxu1 %v6578_v29  ;;  %8604 = vmatmul.mubr.msk.f32.vlgmr.msra.gmra.mrb[50].mxu0 %vm2217_vm15, %v8292_v24 }
 0x537   : > { %8606 = vmatprep.subr.mxu0 %v8917_v1  ;;  %6586 = vmatpush1.msra.mxu1 %v6577_v61 }
 0x538   : > { %8607 = vmatpush3.msra.mxu0 %v9706_v7  ;;  %8293 = vmatmul.mubr.msk.f32.vlgmr.msra.gmra.mrb[16].mxu1 %vm2217_vm15, %v8292_v24 }
 0x539   : > { %6729 = vmatprep.subr.mxu1 %v9690_v53  ;;  %8608 = vmatprep.mubr.msk.f32.mxu0 %vm8928_vm14, %v8917_v1  ;;  %v8297_v53 = vld [vmem:[%s10046_s10 + $0x8] sm:$0xf] }
 0x53a   : > { %v6875_v62 = vpop.permute.xlu0 %6874  ;;  %6730 = vmatpush1.msra.mxu1 %v9694_v63  ;;  %8611 = vmatprep.subr.mxu0 %v8917_v1 }
 0x53b   : > { %v7035_v0 = vpop.permute.xlu1 %7034  ;;  %8609 = vmatmul.mubr.msk.f32.vlgmr.msra.gmra.mrb[52].mxu0 %vm2217_vm15, %v6562_v54  ;;  %v6879_v2 = vsel %vm820_vm3, %v6875_v62, %v6877_v60  ;;  %6793 = vmatprep.mubr.f32.mxu1 %v8917_v1 }
 0x53c   : > { %6886 = vmatprep.subr.mxu1 %v6879_v2  ;;  %8612 = vmatpush3.msra.mxu0 %v6877_v60 }
 0x53d   : > { %8613 = vmatprep.mubr.msk.f32.mxu0 %vm8928_vm14, %v8917_v1  ;;  %8616 = vmatprep.subr.mxu0 %v8917_v1 }
 0x53e   : > { %v6873_v63 = vpop.permute.xlu0 %6872 }
 0x53f   : > { %v7033_v3 = vpop.permute.xlu1 %7032  ;;  %8614 = vmatmul.mubr.msk.f32.vlgmr.msra.gmra.mrb[54].mxu0 %vm2217_vm15, %v8297_v53  ;;  %v6878_v4 = vsel %vm820_vm3, %v6873_v63, %v6875_v62 }
 0x540   : > { %8295 = vmatmul.mubr.msk.f32.vlgmr.msra.gmra.mrb[16].mxu1 %vm2217_vm15, %v6562_v54  ;;  %8618 = vmatprep.mubr.msk.f32.mxu0 %vm8928_vm14, %v8917_v1  ;;  %v7038_v11 = vsel %vm1007_vm4, %v7033_v3, %v7035_v0 }
 0x541   : > { %6887 = vmatpush1.msra.mxu1 %v6878_v4  ;;  %6950 = vmatprep.mubr.f32.mxu1 %v8917_v1 }
 0x542   : > { %v7037_v5 = vpop.permute.xlu0 %7036 }
 0x543   : > { %8617 = vmatpush3.msra.mxu0 %v7037_v5  ;;  %v7197_v7 = vpop.permute.xlu1 %7196  ;;  %v7039_v8 = vsel %vm1007_vm4, %v7035_v0, %v7037_v5 }
 0x544   : > { %7046 = vmatprep.subr.mxu1 %v7039_v8  ;;  %8621 = vmatprep.subr.mxu0 %v8917_v1 }
 0x545   : > { %8619 = vmatmul.mubr.msk.f32.vlgmr.msra.gmra.mrb[56].mxu0 %vm2217_vm15, %v8300_v6 }
 0x546   : > { %8622 = vmatpush3.msra.mxu0 %v7197_v7  ;;  %8623 = vmatprep.mubr.msk.f32.mxu0 %vm8928_vm14, %v8917_v1 }
 0x547   : > { %v7195_v10 = vpop.permute.xlu0 %7194  ;;  %8626 = vmatprep.subr.mxu0 %v8917_v1 }
 0x548   : > { %v7355_v12 = vpop.permute.xlu1 %7354  ;;  %8298 = vmatmul.mubr.msk.f32.vlgmr.msra.gmra.mrb[16].mxu1 %vm2217_vm15, %v8297_v53  ;;  %v7199_v13 = vsel %vm1194_vm5, %v7195_v10, %v7197_v7 }
 0x549   : > { %7047 = vmatpush1.msra.mxu1 %v7038_v11  ;;  %8624 = vmatmul.mubr.msk.f32.vlgmr.msra.gmra.mrb[58].mxu0 %vm2217_vm15, %v8303_v9 }
 0x54a   : > { %7206 = vmatprep.subr.mxu1 %v7199_v13  ;;  %8628 = vmatprep.mubr.msk.f32.mxu0 %vm8928_vm14, %v8917_v1 }
 0x54b   : > { %v7193_v14 = vpop.permute.xlu0 %7192  ;;  %7110 = vmatprep.mubr.f32.mxu1 %v8917_v1 }
 0x54c   : > { %v7353_v15 = vpop.permute.xlu1 %7352  ;;  %v7198_v18 = vsel %vm1194_vm5, %v7193_v14, %v7195_v10 }
 0x54d   : > { %v7358_v27 = vsel %vm1381_vm6, %v7353_v15, %v7355_v12 }
 0x54f   : > { %v7357_v17 = vpop.permute.xlu0 %7356 }
 0x550   : > { %8627 = vmatpush3.msra.mxu0 %v7357_v17  ;;  %8301 = vmatmul.mubr.msk.f32.vlgmr.msra.gmra.mrb[16].mxu1 %vm2217_vm15, %v8300_v6  ;;  %v7359_v20 = vsel %vm1381_vm6, %v7355_v12, %v7357_v17 }
 0x551   : > { %v7517_v19 = vpop.permute.xlu1 %7516  ;;  %8631 = vmatprep.subr.mxu0 %v8917_v1  ;;  %8629 = vmatmul.mubr.msk.f32.vlgmr.msra.gmra.mrb[60].mxu0 %vm2217_vm15, %v8306_v16 }
 0x552   : > { %8632 = vmatpush3.msra.mxu0 %v7517_v19  ;;  %7207 = vmatpush1.msra.mxu1 %v7198_v18 }
 0x553   : > { %v7515_v23 = vpop.permute.xlu0 %7514  ;;  %7366 = vmatprep.subr.mxu1 %v7359_v20  ;;  %8633 = vmatprep.mubr.msk.f32.mxu0 %vm8928_vm14, %v8917_v1 }
 0x554   : > { %7270 = vmatprep.mubr.f32.mxu1 %v8917_v1  ;;  %8636 = vmatprep.subr.mxu0 %v8917_v1  ;;  %v7519_v30 = vsel %vm1568_vm7, %v7515_v23, %v7517_v19 }
 0x555   : > { %v7675_v25 = vpop.permute.xlu1 %7674  ;;  %8634 = vmatmul.mubr.msk.f32.vlgmr.msra.gmra.mrb[62].mxu0 %vm2217_vm15, %v8309_v21 }
 0x556   : > { %8638 = vmatprep.mubr.msk.f32.mxu0 %vm8928_vm14, %v8917_v1 }
 0x557   : > { %v7513_v26 = vpop.permute.xlu0 %7512 }
 0x558   : > { %8304 = vmatmul.mubr.msk.f32.vlgmr.msra.gmra.mrb[16].mxu1 %vm2217_vm15, %v8303_v9  ;;  %v7518_v35 = vsel %vm1568_vm7, %v7513_v26, %v7515_v23 }
 0x559   : > { %v7673_v28 = vpop.permute.xlu1 %7672  ;;  %7367 = vmatpush1.msra.mxu1 %v7358_v27  ;;  %7430 = vmatprep.mubr.f32.mxu1 %v8917_v1 }
 0x55a   : > { %7526 = vmatprep.subr.mxu1 %v7519_v30  ;;  %v7678_v38 = vsel %vm1755_vm8, %v7673_v28, %v7675_v25 }
 0x55b   : > { %v7677_v32 = vpop.permute.xlu0 %7676 }
 0x55c   : > { %8637 = vmatpush3.msra.mxu0 %v7677_v32  ;;  %v7679_v36 = vsel %vm1755_vm8, %v7675_v25, %v7677_v32 }
 0x55d   : > { %v7837_v33 = vpop.permute.xlu1 %7836  ;;  %8639 = vmatmul.mubr.msk.f32.vlgmr.msra.gmra.mrb[64].mxu0 %vm2217_vm15, %v8312_v31  ;;  %8641 = vmatprep.subr.mxu0 %v8917_v1 }
 0x55e   : > { %8642 = vmatpush3.msra.mxu0 %v7837_v33  ;;  %8643 = vmatprep.mubr.msk.f32.mxu0 %vm8928_vm14, %v8917_v1 }
 0x55f   : > { %v7835_v37 = vpop.permute.xlu0 %7834 }
 0x560   : > { %8307 = vmatmul.mubr.msk.f32.vlgmr.msra.gmra.mrb[16].mxu1 %vm2217_vm15, %v8306_v16  ;;  %v7839_v39 = vsel %vm1942_vm9, %v7835_v37, %v7837_v33 }
 0x561   : > { %8644 = vmatmul.mubr.msk.f32.vlgmr.msra.gmra.mrb[66].mxu0 %vm2217_vm15, %v8315_v34  ;;  %7527 = vmatpush1.msra.mxu1 %v7518_v35 }
 0x562   : > { %7686 = vmatprep.subr.mxu1 %v7679_v36  ;;  %7590 = vmatprep.mubr.f32.mxu1 %v8917_v1 }
 0x563   : > { %v7833_v40 = vpop.permute.xlu0 %7832 }
 0x564   : > { %v7838_v41 = vsel %vm1942_vm9, %v7833_v40, %v7835_v37 }
 0x568   : > { %8310 = vmatmul.mubr.msk.f32.vlgmr.msra.gmra.mrb[16].mxu1 %vm2217_vm15, %v8309_v21 }
 0x569   : > { %7687 = vmatpush1.msra.mxu1 %v7678_v38  ;;  %7750 = vmatprep.mubr.f32.mxu1 %v8917_v1 }
 0x56a   : > { %7846 = vmatprep.subr.mxu1 %v7839_v39 }
 0x56e   : > { %v6550_v53 = vpop.permute.xlu1 %6549 }
 0x570   : > { %8313 = vmatmul.mubr.msk.f32.vlgmr.msra.gmra.mrb[16].mxu1 %vm2217_vm15, %v8312_v31 }
 0x571   : > { %7847 = vmatpush1.msra.mxu1 %v7838_v41  ;;  %7910 = vmatprep.mubr.f32.mxu1 %v8917_v1 }
 0x578   : > { %8316 = vmatmul.mubr.msk.f32.vlgmr.msra.gmra.mrb[16].mxu1 %vm2217_vm15, %v8315_v34 }
 0x593   : > { %v5278_v42 = vpop.f32.mrb[32].mxu0 }
 0x594   : > { %v8560_v43 = vpop.f32.mrb[33].mxu0 }
 0x598   : > { %v5422_v44 = vpop.f32.mrb[34].mxu0 }
 0x599   : > { %v5423_v45 = vadd.f32 %v5422_v44, %v5278_v42  ;;  %v8565_v46 = vpop.f32.mrb[35].mxu0 }
 0x59c   : > { %v5579_v47 = vpop.f32.mrb[36].mxu0 }
 0x59d   : > { %v5585_v48 = vadd.f32 %v5579_v47, %v5423_v45  ;;  %v8570_v49 = vpop.f32.mrb[37].mxu0 }
 0x5a1   : > { %v5739_v50 = vpop.f32.mrb[38].mxu0 }
 0x5a2   : > { %v5745_v51 = vadd.f32 %v5739_v50, %v5585_v48  ;;  %v8575_v52 = vpop.f32.mrb[39].mxu0 }
 0x5a6   : > { %v5899_v55 = vpop.f32.mrb[40].mxu0 }
 0x5a7   : > { %v5905_v56 = vadd.f32 %v5899_v55, %v5745_v51  ;;  %v8580_v57 = vpop.f32.mrb[41].mxu0 }
 0x5ab   : > { %v6059_v58 = vpop.f32.mrb[42].mxu0 }
 0x5ac   : > { %v6065_v22 = vadd.f32 %v6059_v58, %v5905_v56  ;;  %v8585_v1 = vpop.f32.mrb[43].mxu0 }
 0x5b3   : > { %v6219_v24 = vpop.f32.mrb[44].mxu0 }
 0x5b4   : > { %v6225_v59 = vadd.f32 %v6219_v24, %v6065_v22  ;;  %v8590_v60 = vpop.f32.mrb[45].mxu0 }
 0x5b7   : > { %v6379_v29 = vpop.f32.mrb[46].mxu0 }
 0x5b8   : > { %v6385_v61 = vadd.f32 %v6379_v29, %v6225_v59  ;;  %v8595_v54 = vpop.f32.mrb[47].mxu0 }
 0x5be   : > { %v6539_v62 = vpop.f32.mrb[48].mxu0 }
 0x5bf   : > { %v6545_v0 = vadd.f32 %v6539_v62, %v6385_v61  ;;  %v8600_v2 = vpop.f32.mrb[49].mxu0 }
 0x5c1   : > { %v6554_v63 = vadd.f32 %v6550_v53, %v6545_v0 }
 0x5c3   : > { %6561 = vst.msk [vmem:[%s437_s1 + $0x8] sm:$0xf] %vm6560_vm0, %v6554_v63 }
 0x5d7   : > { %v6468_v3 = vpop.f32.mrb[14].mxu1 }
 0x5d8   : > { %v6552_v4 = vadd.f32 %v6550_v53, %v6468_v3  ;;  %v6470_v5 = vpop.f32.mrb[15].mxu1 }
 0x5d9   : > { %v6553_v6 = vadd.f32 %v6550_v53, %v6470_v5 }
 0x5db   : > { %v6557_v7 = vcombine.low %v6552_v4, %v6553_v6 }
 0x5dd   : > { %6559 = vst [vmem:[%s437_s1] sm:$0xff] %v6557_v7 }
 0x5de   : > { %8834 = shalt.err (!%p8831_p3)
}
 0x5df   : > { %s8835_s1 = scalar_lea.hbm %s9959_s22, 192  ;;  %s8839_s30 = scalar_lea.hbm %s10048_s12, 384 }
 0x5e0   : > { %p8836_p4 = scmp.ne.s32.totalorder %s9959_s22, %s8835_s1  ;;  %p8840_p9 = scmp.lt.u32.totalorder %s9959_s22, %s10048_s12 }
 0x5e1   : > { %p8841_p10 = scmp.lt.u32.totalorder %s8839_s30, %s8835_s1  ;;  %p8843_p12 = scmp.lt.u32.totalorder %s8835_s1, %s9959_s22 }
 0x5e2   : > { %p8837_p7 = pnand %p8836_p4, %p9039_p5 }
 0x5e3   : > { %p8842_p11 = por %p8841_p10, %p8840_p9 }
 0x5e4   : > { %p8838_p8 = pneg %p8837_p7 }
 0x5e5   : > { %p8844_p13 = por %p8843_p12, %p8842_p11 }
 0x5e7   : > { %p8845_p0 = pnand %p8844_p13, %p8838_p8 }
 0x5e9   : > { %8848 = shalt.err (!%p8845_p0)
}
 0x5ea   : > { %8762 = dma.vmem_to_hbm [thread:$0]  (%p9039_p5), %s9961_s24, 192, %s9959_s22, %s8006_s0   ;;  %v7994_v37 = vpop.permute.xlu0 %7993 }
 0x5eb   : > { %s10089_s3 = smul.u32 12, %s9947_s23  ;;  %s8011_s2 = scalar_lea.sflag [#allocation7], %s9947_s23 }
 0x5ec   : > { %s10090_s22 = smul.u32 192, %s9022_s29  ;;  %s8930_s30 = smov [#allocation6]  }
 0x5ed   : > { %s444_s16 = scalar_lea.vmem [#allocation6], %s10089_s3  ;;  %s8853_s20 = sshll.u32 %s8930_s30, 4  ;;  %s8854_s20 = int_to_ptr.vmem [resolvable:$false] %s8853_s20 }
 0x5ee   : > { %s8039_s24 = sshll.u32 %s444_s16, 4  ;;  %s9993_s1 = scalar_lea.hbm %s10049_s13, %s10090_s22  ;;  %s9995_s24 = int_to_ptr.vmem [resolvable:$true] %s8039_s24 }
 0x5ef   : > { %s8849_s21 = scalar_lea.vmem %s9995_s24, 192  ;;  %s8855_s29 = scalar_lea.vmem %s8854_s20, 384 }
 0x5f0   : > { %p8850_p1 = scmp.ne.s32.totalorder %s9995_s24, %s8849_s21  ;;  %p8856_p4 = scmp.lt.s32.totalorder %s9995_s24, %s8854_s20 }
 0x5f1   : > { %p8857_p7 = scmp.lt.s32.totalorder %s8855_s29, %s8849_s21 }
 0x5f2   : > { %p8851_p2 = pnand %p8850_p1, %p9039_p5 }
 0x5f3   : > { %p8858_p8 = por %p8857_p7, %p8856_p4 }
 0x5f4   : > { %p8852_p3 = pneg %p8851_p2 }
 0x5f6   : > { %p8859_p9 = pnand %p8858_p8, %p8852_p3 }
 0x609   : > { %v6722_v8 = vpop.f32.mrb[50].mxu0 }
 0x60a   : > { %v8605_v9 = vpop.f32.mrb[51].mxu0 }
 0x60e   : > { %v6866_v10 = vpop.f32.mrb[52].mxu0 }
 0x60f   : > { %v6867_v11 = vadd.f32 %v6866_v10, %v6722_v8  ;;  %v8610_v12 = vpop.f32.mrb[53].mxu0 }
 0x612   : > { %v7023_v13 = vpop.f32.mrb[54].mxu0 }
 0x613   : > { %v7029_v14 = vadd.f32 %v7023_v13, %v6867_v11  ;;  %v8615_v15 = vpop.f32.mrb[55].mxu0 }
 0x618   : > { %v7183_v16 = vpop.f32.mrb[56].mxu0 }
 0x619   : > { %v7189_v17 = vadd.f32 %v7183_v16, %v7029_v14  ;;  %v8620_v18 = vpop.f32.mrb[57].mxu0 }
 0x61c   : > { %v7343_v19 = vpop.f32.mrb[58].mxu0 }
 0x61d   : > { %v7349_v20 = vadd.f32 %v7343_v19, %v7189_v17  ;;  %v8625_v21 = vpop.f32.mrb[59].mxu0 }
 0x624   : > { %v7503_v23 = vpop.f32.mrb[60].mxu0 }
 0x625   : > { %v7509_v25 = vadd.f32 %v7503_v23, %v7349_v20  ;;  %v8630_v26 = vpop.f32.mrb[61].mxu0 }
 0x628   : > { %v7663_v27 = vpop.f32.mrb[62].mxu0 }
 0x629   : > { %v7669_v28 = vadd.f32 %v7663_v27, %v7509_v25  ;;  %v8635_v30 = vpop.f32.mrb[63].mxu0 }
 0x630   : > { %v7823_v31 = vpop.f32.mrb[64].mxu0 }
 0x631   : > { %v7829_v32 = vadd.f32 %v7823_v31, %v7669_v28  ;;  %v8640_v33 = vpop.f32.mrb[65].mxu0 }
 0x634   : > { %v7983_v34 = vpop.f32.mrb[66].mxu0 }
 0x635   : > { %v7989_v35 = vadd.f32 %v7983_v34, %v7829_v32  ;;  %v8645_v36 = vpop.f32.mrb[67].mxu0 }
 0x637   : > { %v7998_v38 = vadd.f32 %v7994_v37, %v7989_v35 }
 0x639   : > { %8004 = vst.msk [vmem:[%s444_s16 + $0x8] sm:$0xf] %vm6560_vm0, %v7998_v38 }
 0x64b   : > { %v7912_v39 = vpop.f32.mrb[16].mxu1 }
 0x64c   : > { %v7996_v40 = vadd.f32 %v7994_v37, %v7912_v39  ;;  %v7914_v41 = vpop.f32.mrb[17].mxu1 }
 0x64d   : > { %v7997_v42 = vadd.f32 %v7994_v37, %v7914_v41 }
 0x64f   : > { %v8001_v43 = vcombine.low %v7996_v40, %v7997_v42 }
 0x651   : > { %8003 = vst [vmem:[%s444_s16] sm:$0xff] %v8001_v43 }
 0x652   : > { %8862 = shalt.err (!%p8859_p9)
}
 0x653   : > { %s8863_s23 = scalar_lea.hbm %s9993_s1, 192  ;;  %s8867_s22 = scalar_lea.hbm %s10049_s13, 384 }
 0x654   : > { %p8864_p10 = scmp.ne.s32.totalorder %s9993_s1, %s8863_s23  ;;  %p8868_p13 = scmp.lt.u32.totalorder %s9993_s1, %s10049_s13 }
 0x655   : > { %p8869_p0 = scmp.lt.u32.totalorder %s8867_s22, %s8863_s23  ;;  %p8871_p2 = scmp.lt.u32.totalorder %s8863_s23, %s9993_s1 }
 0x656   : > { %p8865_p11 = pnand %p8864_p10, %p9039_p5 }
 0x657   : > { %p8870_p1 = por %p8869_p0, %p8868_p13 }
 0x658   : > { %p8866_p12 = pneg %p8865_p11 }
 0x659   : > { %p8872_p3 = por %p8871_p2, %p8870_p1 }
 0x65b   : > { %p8873_p4 = pnand %p8872_p3, %p8866_p12 }
 0x65d   : > { %8876 = shalt.err (!%p8873_p4)
}
 0x65e   : > { %8763 = dma.vmem_to_hbm [thread:$0]  (%p9039_p5), %s9995_s24, 192, %s9993_s1, %s8011_s2  }
 0x65f PF: > { %p8773_p7 = scmp.ge.s32.totalorder %s8915_s28, 2  ;;  %s8051_s21 = sand.u32 1, %s8903_s25  }
 0x660   : > { %s8052_s30 = scalar_lea.sflag [#allocation5], %s8051_s21 }
 0x661   : > { %p8767_p8 = pnand %p8773_p7, %p9043_p6 }
 0x663   : > { %8894 = dma.done.wait (!%p8767_p8), %s8052_s30, 192  }
 0x664   : > { %8896 = vsyncadd (!%p8767_p8), %s8052_s30, 4294967104  ;;  %s8061_s20 = scalar_lea.sflag [#allocation7], %s8051_s21 }
 0x665   : > { %8898 = dma.done.wait (!%p8767_p8), %s8061_s20, 192  }
 0x666   : > { %8900 = vsyncadd (!%p8767_p8), %s8061_s20, 4294967104  ;;  %p27_p5 = scmp.ge.s32.totalorder %s9026_s14, 4   ;;  %s10091_s25 = smov %s8907_s26 }
 0x667   : > { %s10092_s26 = smov %s8911_s27  ;;  %s10093_s27 = smov %s9037_s17 }
 0x668   : > { %s10094_s28 = smov %s9026_s14  ;;  %29 = sbr.rel (!%p27_p5) target bundleno = 10 (0xa), region = 160 }
 0x66f   :  { %8066 = vsyncpa [#allocation5], 1 }
 0x670   :  { %8068 = vsyncpa [#allocation5 + $0x1], 1 }
 0x671   :  { %8069 = vsyncpa [#allocation7], 1 }
 0x672   :  { %8071 = vsyncpa [#allocation7 + $0x1], 1 }

</bundles_post_ra>
